<compile_context>
chip_gen: v7x
topology: tpu7x:2x2x1
jax: 0.10.0
libtpu: 0.0.40
codegen_flags: <defaults>
</compile_context>

<pallas_src>
import jax
import jax.numpy as jnp
from jax import lax
from jax.experimental import pallas as pl
from jax.experimental.pallas import tpu as pltpu
import numpy as np


def _round_up(n, m):
    return ((n + m - 1) // m) * m


# ----------------------------- Pallas kernel ------------------------------ #
def _make_encoder_kernel(Tt, B_pad, H1, H2, mxu_dtype):
    """Kernel factory. Tt timesteps per grid step; H1/H2 are the (lane-padded)
    per-layer hidden sizes; B_pad is the sublane-padded batch."""

    cast = (lambda v: v.astype(mxu_dtype)) if mxu_dtype != jnp.float32 else (lambda v: v)

    def kernel(x_ref, wih1_ref, whh1_ref, b1_ref, wih2_ref, whh2_ref, b2_ref,
               out_ref, h1_ref, c1_ref, h2_ref, c2_ref):
        # Zero-init both layers' (h, c) on the first time-block (h_0/c_0 = 0).
        @pl.when(pl.program_id(0) == 0)
        def _init():
            h1_ref[...] = jnp.zeros_like(h1_ref)
            c1_ref[...] = jnp.zeros_like(c1_ref)
            h2_ref[...] = jnp.zeros_like(h2_ref)
            c2_ref[...] = jnp.zeros_like(c2_ref)

        wih1 = wih1_ref[...]
        whh1 = whh1_ref[...]
        wih2 = wih2_ref[...]
        whh2 = whh2_ref[...]

        # ---- Hoisted layer-1 input projection (+ bias) for the whole block.
        # One well-shaped (Tt*B, F) x (F, 4H1) matmul, off the recurrence
        # critical path; bias folded in once.
        xg1 = (jnp.dot(cast(x_ref[...]), wih1,
                       preferred_element_type=jnp.float32)
               + b1_ref[...])                                  # (Tt*B, 4H1) f32

        # Hoisted broadcasts / masks (re-emitted per-iter if left in the loop).
        b2b = jnp.broadcast_to(b2_ref[...], (B_pad, 4 * H2))
        lane1 = lax.broadcasted_iota(jnp.int32, (B_pad, 4 * H1), 1)
        g_mask1 = (lane1 >= 2 * H1) & (lane1 < 3 * H1)
        lane2 = lax.broadcasted_iota(jnp.int32, (B_pad, 4 * H2), 1)
        g_mask2 = (lane2 >= 2 * H2) & (lane2 < 3 * H2)

        def cell_update(gates, c, g_mask, H):
            # Two full-width nonlinearities over the whole 4H gate vreg, one
            # select, then static lane slices for the state update.
            sig = jax.nn.sigmoid(gates)
            tnh = jnp.tanh(gates)
            act = jnp.where(g_mask, tnh, sig)
            i_g = act[:, 0 * H:1 * H]
            f_g = act[:, 1 * H:2 * H]
            g_g = act[:, 2 * H:3 * H]
            o_g = act[:, 3 * H:4 * H]
            c_new = f_g * c + i_g * g_g
            h_new = o_g * jnp.tanh(c_new)
            return h_new, c_new

        # Carry recurrent state in registers across the unrolled block.
        h1 = h1_ref[...]
        c1 = c1_ref[...]
        h2 = h2_ref[...]
        c2 = c2_ref[...]

        # TODO(synk): for Tt >= 32 sweep a lax.fori_loop(..., unroll=4..8)
        # variant to bound live ranges; full unroll is fine at Tt <= 8.
        for i in range(Tt):
            # Layer 1: precomputed input gates + serial h @ W_hh.
            gates1 = xg1[i * B_pad:(i + 1) * B_pad, :] + jnp.dot(
                cast(h1), whh1, preferred_element_type=jnp.float32)
            h1, c1 = cell_update(gates1, c1, g_mask1, H1)

            # Layer 2 (input is the freshly computed h1 -> cannot be hoisted).
            gates2 = (jnp.dot(cast(h1), wih2, preferred_element_type=jnp.float32)
                      + jnp.dot(cast(h2), whh2, preferred_element_type=jnp.float32)
                      + b2b)
            h2, c2 = cell_update(gates2, c2, g_mask2, H2)

            # Per-step store: bounds vreg live ranges and hides under MXU
            # latency on the otherwise-idle vst slot.
            out_ref[:, i * H2:(i + 1) * H2] = h2.astype(out_ref.dtype)

        # Persist state for the next time-block.
        h1_ref[...] = h1
        c1_ref[...] = c1
        h2_ref[...] = h2
        c2_ref[...] = c2

    return kernel


# --------------------------- Padding helpers -------------------------------- #
def _pad_gate_columns(w, H, Hp):
    """w: (..., 4H) packed [i|f|g|o] -> (..., 4Hp), each gate zero-padded."""
    if Hp == H:
        return w
    blocks = [w[..., k * H:(k + 1) * H] for k in range(4)]
    pad = [(0, 0)] * (w.ndim - 1) + [(0, Hp - H)]
    return jnp.concatenate([jnp.pad(b, pad) for b in blocks], axis=-1)


def _pad_rows(w, n, n_p):
    if n_p == n:
        return w
    return jnp.pad(w, ((0, n_p - n), (0, 0)))


# ------------------------------- Wrapper ----------------------------------- #
def encoder_forward(x, params, *, use_bf16=False):
    """x: (B, T, F) float32 batch-first. params: fused-gate packed params
    (wih1 (F,4H1), whh1 (H1,4H1), b1 (1,4H1), wih2 (H1,4H2), whh2 (H2,4H2),
     b2 (1,4H2)). Returns (outputs, recurrent_features), both (B, T, H2),
    mirroring the PyTorch module."""
    wih1, whh1, b1, wih2, whh2, b2 = params
    B, T, F = x.shape
    H1 = whh1.shape[0]
    H2 = whh2.shape[0]

    # Lane / sublane padding: per-gate width -> multiple of 32 (4H gate slab
    # becomes a multiple of 128 lanes), batch -> full f32 sublane tile.
    # Zero padding is exact (padded h/c lanes stay 0, padded rows sliced off).
    H1p = _round_up(H1, 32)
    H2p = _round_up(H2, 32)
    B_pad = _round_up(B, 8)

    wih1p = _pad_gate_columns(wih1, H1, H1p)
    whh1p = _pad_gate_columns(_pad_rows(whh1, H1, H1p), H1, H1p)
    b1p = _pad_gate_columns(b1, H1, H1p)
    wih2p = _pad_gate_columns(_pad_rows(wih2, H1, H1p), H2, H2p)
    whh2p = _pad_gate_columns(_pad_rows(whh2, H2, H2p), H2, H2p)
    b2p = _pad_gate_columns(b2, H2, H2p)

    # bf16 MXU operands: weights cast once here (halves weight DMA bytes /
    # VMEM residency); activations cast in-kernel; gates/c/h/bias stay f32.
    mxu_dtype = jnp.bfloat16 if use_bf16 else jnp.float32
    wih1p = wih1p.astype(mxu_dtype)
    whh1p = whh1p.astype(mxu_dtype)
    wih2p = wih2p.astype(mxu_dtype)
    whh2p = whh2p.astype(mxu_dtype)

    # Time blocking: Tt timesteps per grid step.
    Tt = T if T <= 32 else 32
    Tpad = _round_up(T, Tt)

    x_p = x
    if Tpad != T or B_pad != B:
        # Padded timesteps / batch rows only affect discarded outputs.
        x_p = jnp.pad(x, ((0, B_pad - B), (0, Tpad - T), (0, 0)))

    # Time-major flattened (Tpad*B_pad, F): one dense slab per block for the
    # hoisted input projection and aligned per-step sublane slices in-kernel.
    x_tm = jnp.transpose(x_p, (1, 0, 2)).reshape(Tpad * B_pad, F)

    kernel = _make_encoder_kernel(Tt, B_pad, H1p, H2p, mxu_dtype)

    out_flat = pl.pallas_call(
        kernel,
        out_shape=jax.ShapeDtypeStruct((B_pad, Tpad * H2p), jnp.float32),
        grid_spec=pltpu.PrefetchScalarGridSpec(
            num_scalar_prefetch=0,
            grid=(Tpad // Tt,),
            in_specs=[
                pl.BlockSpec((Tt * B_pad, F), lambda t: (t, 0)),   # x time-chunk
                # Weights/biases: full-array blocks with constant index_map ->
                # fetched once, resident across the sequential time grid.
                # TODO(synk): on v7x at large H, use pipeline_mode=pl.Buffered(1)
                # on these revisited blocks (and tile W_hh over gate columns) to
                # fit the 64 MiB VMEM.
                pl.BlockSpec((F, 4 * H1p), lambda t: (0, 0)),
                pl.BlockSpec((H1p, 4 * H1p), lambda t: (0, 0)),
                pl.BlockSpec((1, 4 * H1p), lambda t: (0, 0)),
                pl.BlockSpec((H1p, 4 * H2p), lambda t: (0, 0)),
                pl.BlockSpec((H2p, 4 * H2p), lambda t: (0, 0)),
                pl.BlockSpec((1, 4 * H2p), lambda t: (0, 0)),
            ],
            out_specs=pl.BlockSpec((B_pad, Tt * H2p), lambda t: (0, t)),
            scratch_shapes=[
                pltpu.VMEM((B_pad, H1p), jnp.float32),   # h1
                pltpu.VMEM((B_pad, H1p), jnp.float32),   # c1
                pltpu.VMEM((B_pad, H2p), jnp.float32),   # h2
                pltpu.VMEM((B_pad, H2p), jnp.float32),   # c2
            ],
        ),
        compiler_params=pltpu.CompilerParams(
            # The time recurrence is inherently sequential.
            # TODO(synk): on v7x with large batch, add a leading 'parallel'
            # batch grid axis so the two TensorCores split the batch.
            dimension_semantics=("arbitrary",),
            vmem_limit_bytes=32 * 1024 * 1024),
    )(x_tm, wih1p, whh1p, b1p, wih2p, whh2p, b2p)

    outputs = out_flat.reshape(B_pad, Tpad, H2p)[:B, :T, :H2]
    # PyTorch module returns (outputs, recurrent_features): same tensor here.
    return outputs, outputs


# --------------------------- Parameter creation ---------------------------- #
def make_lstm_params(key, input_size, hidden_size):
    """PyTorch LSTM shapes: W_ih (4H, in), W_hh (4H, H), b_ih/b_hh (4H), gate
    row order [i; f; g; o]. Repacked as fused-gate W_ih (in, 4H), W_hh (H, 4H),
    b (1, 4H) with gate column order [i | f | g | o]."""
    k1, k2, k3, k4 = jax.random.split(key, 4)
    bound = 1.0 / np.sqrt(hidden_size)
    w_ih = jax.random.uniform(k1, (4 * hidden_size, input_size), jnp.float32, -bound, bound)
    w_hh = jax.random.uniform(k2, (4 * hidden_size, hidden_size), jnp.float32, -bound, bound)
    b_ih = jax.random.uniform(k3, (4 * hidden_size,), jnp.float32, -bound, bound)
    b_hh = jax.random.uniform(k4, (4 * hidden_size,), jnp.float32, -bound, bound)

    w_ih_k = jnp.transpose(w_ih)                            # (in, 4H)
    w_hh_k = jnp.transpose(w_hh)                            # (H, 4H)
    b_k = (b_ih + b_hh).reshape(1, 4 * hidden_size)         # (1, 4H)
    return w_ih_k, w_hh_k, b_k


# --------------------------- Pure-JAX reference ---------------------------- #
def reference_forward(x, params):
    wih1, whh1, b1, wih2, whh2, b2 = params

    def run_layer(x_tm, wih, whh, b):
        H = whh.shape[0]
        B = x_tm.shape[1]

        def step(carry, x_t):
            h, c = carry
            g = (jnp.dot(x_t, wih, precision=lax.Precision.HIGHEST)
                 + jnp.dot(h, whh, precision=lax.Precision.HIGHEST) + b)
            i = jax.nn.sigmoid(g[:, :H])
            f = jax.nn.sigmoid(g[:, H:2 * H])
            gg = jnp.tanh(g[:, 2 * H:3 * H])
            o = jax.nn.sigmoid(g[:, 3 * H:])
            c_new = f * c + i * gg
            h_new = o * jnp.tanh(c_new)
            return (h_new, c_new), h_new

        init = (jnp.zeros((B, H), jnp.float32), jnp.zeros((B, H), jnp.float32))
        _, hs = jax.lax.scan(step, init, x_tm)
        return hs

    x_tm = jnp.transpose(x, (1, 0, 2))
    h1_seq = run_layer(x_tm, wih1, whh1, b1)
    h2_seq = run_layer(h1_seq, wih2, whh2, b2)
    out = jnp.transpose(h2_seq, (1, 0, 2))
    return out, out


# ---------------------------------- Main ----------------------------------- #
if __name__ == "__main__":
    batch = 2
    seq_len = 8
    n_features = 4
    embedding_dim = 16
    hidden_dim = 2 * embedding_dim  # 32

    key = jax.random.PRNGKey(0)
    kx, k1, k2 = jax.random.split(key, 3)

    x = jax.random.normal(kx, (batch, seq_len, n_features), jnp.float32)

    wih1, whh1, b1 = make_lstm_params(k1, n_features, hidden_dim)     # lstm1
    wih2, whh2, b2 = make_lstm_params(k2, hidden_dim, embedding_dim)  # lstm2
    params = (wih1, whh1, b1, wih2, whh2, b2)

    ref_out, _ = reference_forward(x, params)

    # f32 path: strict precision contract (matches PyTorch f32 semantics).
    outputs, recurrent_features = encoder_forward(x, params, use_bf16=False)
    outputs = jax.block_until_ready(outputs)
    recurrent_features = jax.block_until_ready(recurrent_features)
    np.testing.assert_allclose(np.asarray(outputs), np.asarray(ref_out),
                               rtol=1e-5, atol=1e-5)
    assert outputs.shape == (batch, seq_len, embedding_dim)

    # bf16-MXU path (perf variant): relaxed tolerance.
    outputs_bf16, _ = encoder_forward(x, params, use_bf16=True)
    outputs_bf16 = jax.block_until_ready(outputs_bf16)
    np.testing.assert_allclose(np.asarray(outputs_bf16), np.asarray(ref_out),
                               rtol=5e-2, atol=5e-2)

    print("KERNEL_OK")
</pallas_src>

<mosaic_0001>
module attributes {stable_mosaic.version = 11 : i64} {
  func.func @kernel(%arg0: i32, %arg1: memref<64x4xf32, #tpu.memory_space<vmem>>, %arg2: memref<4x128xf32, #tpu.memory_space<vmem>>, %arg3: memref<32x128xf32, #tpu.memory_space<vmem>>, %arg4: memref<1x128xf32, #tpu.memory_space<vmem>>, %arg5: memref<32x128xf32, #tpu.memory_space<vmem>>, %arg6: memref<32x128xf32, #tpu.memory_space<vmem>>, %arg7: memref<1x128xf32, #tpu.memory_space<vmem>>, %arg8: memref<8x256xf32, #tpu.memory_space<vmem>>, %arg9: memref<8x32xf32, #tpu.memory_space<vmem>>, %arg10: memref<8x32xf32, #tpu.memory_space<vmem>>, %arg11: memref<8x32xf32, #tpu.memory_space<vmem>>, %arg12: memref<8x32xf32, #tpu.memory_space<vmem>>) attributes {dimension_semantics = [#tpu.dimension_semantics<arbitrary>], iteration_bounds = array<i64: 1>, scalar_prefetch = 0 : i64, scratch_operands = 4 : i64, tpu.core_type = #tpu.core_type<tc>, window_params = [{transform_indices = @transform_0, window_bounds = array<i64: 64, 4>}, {pipeline_mode = #tpu.pipeline_mode<synchronous>, transform_indices = @transform_1, window_bounds = array<i64: 4, 128>}, {pipeline_mode = #tpu.pipeline_mode<synchronous>, transform_indices = @transform_2, window_bounds = array<i64: 32, 128>}, {pipeline_mode = #tpu.pipeline_mode<synchronous>, transform_indices = @transform_3, window_bounds = array<i64: 1, 128>}, {pipeline_mode = #tpu.pipeline_mode<synchronous>, transform_indices = @transform_4, window_bounds = array<i64: 32, 128>}, {pipeline_mode = #tpu.pipeline_mode<synchronous>, transform_indices = @transform_5, window_bounds = array<i64: 32, 128>}, {pipeline_mode = #tpu.pipeline_mode<synchronous>, transform_indices = @transform_6, window_bounds = array<i64: 1, 128>}, {transform_indices = @transform_7, window_bounds = array<i64: 8, 256>}]} {
    %c0_i32 = arith.constant 0 : i32
    %0 = arith.cmpi eq, %arg0, %c0_i32 : i32
    %1 = arith.extui %0 : i1 to i32
    %c0_i32_0 = arith.constant 0 : i32
    %2 = arith.cmpi ne, %1, %c0_i32_0 : i32
    scf.if %2 {
      %cst_81 = arith.constant 0.000000e+00 : f32
      %355 = vector.broadcast %cst_81 : f32 to vector<8x32xf32>
      %c0_82 = arith.constant 0 : index
      %c0_83 = arith.constant 0 : index
      %356 = vector.load %arg9[%c0_82, %c0_83] : memref<8x32xf32, #tpu.memory_space<vmem>>, vector<8x32xf32>
      tpu.vector_store %arg9[%c0_82, %c0_83], %355 {strides = array<i32>} : memref<8x32xf32, #tpu.memory_space<vmem>>, vector<8x32xf32>,
      %cst_84 = arith.constant 0.000000e+00 : f32
      %357 = vector.broadcast %cst_84 : f32 to vector<8x32xf32>
      %c0_85 = arith.constant 0 : index
      %c0_86 = arith.constant 0 : index
      %358 = vector.load %arg10[%c0_85, %c0_86] : memref<8x32xf32, #tpu.memory_space<vmem>>, vector<8x32xf32>
      tpu.vector_store %arg10[%c0_85, %c0_86], %357 {strides = array<i32>} : memref<8x32xf32, #tpu.memory_space<vmem>>, vector<8x32xf32>,
      %cst_87 = arith.constant 0.000000e+00 : f32
      %359 = vector.broadcast %cst_87 : f32 to vector<8x32xf32>
      %c0_88 = arith.constant 0 : index
      %c0_89 = arith.constant 0 : index
      %360 = vector.load %arg11[%c0_88, %c0_89] : memref<8x32xf32, #tpu.memory_space<vmem>>, vector<8x32xf32>
      tpu.vector_store %arg11[%c0_88, %c0_89], %359 {strides = array<i32>} : memref<8x32xf32, #tpu.memory_space<vmem>>, vector<8x32xf32>,
      %cst_90 = arith.constant 0.000000e+00 : f32
      %361 = vector.broadcast %cst_90 : f32 to vector<8x32xf32>
      %c0_91 = arith.constant 0 : index
      %c0_92 = arith.constant 0 : index
      %362 = vector.load %arg12[%c0_91, %c0_92] : memref<8x32xf32, #tpu.memory_space<vmem>>, vector<8x32xf32>
      tpu.vector_store %arg12[%c0_91, %c0_92], %361 {strides = array<i32>} : memref<8x32xf32, #tpu.memory_space<vmem>>, vector<8x32xf32>,
    } else {
    }
    %c0 = arith.constant 0 : index
    %c0_1 = arith.constant 0 : index
    %3 = vector.load %arg2[%c0, %c0_1] : memref<4x128xf32, #tpu.memory_space<vmem>>, vector<4x128xf32>
    %c0_2 = arith.constant 0 : index
    %c0_3 = arith.constant 0 : index
    %4 = vector.load %arg3[%c0_2, %c0_3] : memref<32x128xf32, #tpu.memory_space<vmem>>, vector<32x128xf32>
    %c0_4 = arith.constant 0 : index
    %c0_5 = arith.constant 0 : index
    %5 = vector.load %arg5[%c0_4, %c0_5] : memref<32x128xf32, #tpu.memory_space<vmem>>, vector<32x128xf32>
    %c0_6 = arith.constant 0 : index
    %c0_7 = arith.constant 0 : index
    %6 = vector.load %arg6[%c0_6, %c0_7] : memref<32x128xf32, #tpu.memory_space<vmem>>, vector<32x128xf32>
    %c0_8 = arith.constant 0 : index
    %c0_9 = arith.constant 0 : index
    %7 = vector.load %arg1[%c0_8, %c0_9] : memref<64x4xf32, #tpu.memory_space<vmem>>, vector<64x4xf32>
    %cst = arith.constant dense<0.000000e+00> : vector<64x128xf32>
    %8 = tpu.matmul %7, %3, %cst {dimension_numbers = #tpu.dot_dimension_numbers<[1], [0], [0], [1], [0, 0, 1, 1], [], []>} : vector<64x4xf32>, vector<4x128xf32>, vector<64x128xf32> -> vector<64x128xf32>
    %c0_10 = arith.constant 0 : index
    %c0_11 = arith.constant 0 : index
    %9 = vector.load %arg4[%c0_10, %c0_11] : memref<1x128xf32, #tpu.memory_space<vmem>>, vector<1x128xf32>
    %10 = vector.broadcast %9 : vector<1x128xf32> to vector<64x128xf32>
    %11 = arith.addf %8, %10 : vector<64x128xf32>
    %c0_12 = arith.constant 0 : index
    %c0_13 = arith.constant 0 : index
    %12 = vector.load %arg7[%c0_12, %c0_13] : memref<1x128xf32, #tpu.memory_space<vmem>>, vector<1x128xf32>
    %13 = vector.shape_cast %12 : vector<1x128xf32> to vector<1x128xf32>
    %14 = vector.broadcast %13 : vector<1x128xf32> to vector<8x128xf32>
    %15 = tpu.iota {dimensions = array<i32: 1>} : vector<8x128xi32>
    %c64_i32 = arith.constant 64 : i32
    %16 = vector.broadcast %c64_i32 : i32 to vector<8x128xi32>
    %17 = arith.cmpi sge, %15, %16 : vector<8x128xi32>
    %c96_i32 = arith.constant 96 : i32
    %18 = vector.broadcast %c96_i32 : i32 to vector<8x128xi32>
    %19 = arith.cmpi slt, %15, %18 : vector<8x128xi32>
    %20 = arith.andi %17, %19 : vector<8x128xi1>
    %21 = tpu.iota {dimensions = array<i32: 1>} : vector<8x128xi32>
    %c64_i32_14 = arith.constant 64 : i32
    %22 = vector.broadcast %c64_i32_14 : i32 to vector<8x128xi32>
    %23 = arith.cmpi sge, %21, %22 : vector<8x128xi32>
    %c96_i32_15 = arith.constant 96 : i32
    %24 = vector.broadcast %c96_i32_15 : i32 to vector<8x128xi32>
    %25 = arith.cmpi slt, %21, %24 : vector<8x128xi32>
    %26 = arith.andi %23, %25 : vector<8x128xi1>
    %c0_16 = arith.constant 0 : index
    %c0_17 = arith.constant 0 : index
    %27 = vector.load %arg9[%c0_16, %c0_17] : memref<8x32xf32, #tpu.memory_space<vmem>>, vector<8x32xf32>
    %c0_18 = arith.constant 0 : index
    %c0_19 = arith.constant 0 : index
    %28 = vector.load %arg10[%c0_18, %c0_19] : memref<8x32xf32, #tpu.memory_space<vmem>>, vector<8x32xf32>
    %c0_20 = arith.constant 0 : index
    %c0_21 = arith.constant 0 : index
    %29 = vector.load %arg11[%c0_20, %c0_21] : memref<8x32xf32, #tpu.memory_space<vmem>>, vector<8x32xf32>
    %c0_22 = arith.constant 0 : index
    %c0_23 = arith.constant 0 : index
    %30 = vector.load %arg12[%c0_22, %c0_23] : memref<8x32xf32, #tpu.memory_space<vmem>>, vector<8x32xf32>
    %31 = vector.extract_strided_slice %11 {offsets = [0, 0], sizes = [8, 128], strides = [1, 1]} : vector<64x128xf32> to vector<8x128xf32>
    %cst_24 = arith.constant dense<0.000000e+00> : vector<8x128xf32>
    %32 = tpu.matmul %27, %4, %cst_24 {dimension_numbers = #tpu.dot_dimension_numbers<[1], [0], [0], [1], [0, 0, 1, 1], [], []>} : vector<8x32xf32>, vector<32x128xf32>, vector<8x128xf32> -> vector<8x128xf32>
    %33 = arith.addf %31, %32 : vector<8x128xf32>
    %34 = arith.negf %33 : vector<8x128xf32>
    %35 = math.exp %34 : vector<8x128xf32>
    %cst_25 = arith.constant 1.000000e+00 : f32
    %36 = vector.broadcast %cst_25 : f32 to vector<8x128xf32>
    %37 = arith.addf %36, %35 : vector<8x128xf32>
    %38 = arith.divf %36, %37 : vector<8x128xf32>
    %39 = math.tanh %33 : vector<8x128xf32>
    %40 = arith.select %20, %39, %38 : vector<8x128xi1>, vector<8x128xf32>
    %41 = vector.extract_strided_slice %40 {offsets = [0, 0], sizes = [8, 32], strides = [1, 1]} : vector<8x128xf32> to vector<8x32xf32>
    %42 = vector.extract_strided_slice %40 {offsets = [0, 32], sizes = [8, 32], strides = [1, 1]} : vector<8x128xf32> to vector<8x32xf32>
    %43 = vector.extract_strided_slice %40 {offsets = [0, 64], sizes = [8, 32], strides = [1, 1]} : vector<8x128xf32> to vector<8x32xf32>
    %44 = vector.extract_strided_slice %40 {offsets = [0, 96], sizes = [8, 32], strides = [1, 1]} : vector<8x128xf32> to vector<8x32xf32>
    %45 = arith.mulf %42, %28 : vector<8x32xf32>
    %46 = arith.mulf %41, %43 : vector<8x32xf32>
    %47 = arith.addf %45, %46 : vector<8x32xf32>
    %48 = math.tanh %47 : vector<8x32xf32>
    %49 = arith.mulf %44, %48 : vector<8x32xf32>
    %cst_26 = arith.constant dense<0.000000e+00> : vector<8x128xf32>
    %50 = tpu.matmul %49, %5, %cst_26 {dimension_numbers = #tpu.dot_dimension_numbers<[1], [0], [0], [1], [0, 0, 1, 1], [], []>} : vector<8x32xf32>, vector<32x128xf32>, vector<8x128xf32> -> vector<8x128xf32>
    %cst_27 = arith.constant dense<0.000000e+00> : vector<8x128xf32>
    %51 = tpu.matmul %29, %6, %cst_27 {dimension_numbers = #tpu.dot_dimension_numbers<[1], [0], [0], [1], [0, 0, 1, 1], [], []>} : vector<8x32xf32>, vector<32x128xf32>, vector<8x128xf32> -> vector<8x128xf32>
    %52 = arith.addf %50, %51 : vector<8x128xf32>
    %53 = arith.addf %52, %14 : vector<8x128xf32>
    %54 = arith.negf %53 : vector<8x128xf32>
    %55 = math.exp %54 : vector<8x128xf32>
    %cst_28 = arith.constant 1.000000e+00 : f32
    %56 = vector.broadcast %cst_28 : f32 to vector<8x128xf32>
    %57 = arith.addf %56, %55 : vector<8x128xf32>
    %58 = arith.divf %56, %57 : vector<8x128xf32>
    %59 = math.tanh %53 : vector<8x128xf32>
    %60 = arith.select %26, %59, %58 : vector<8x128xi1>, vector<8x128xf32>
    %61 = vector.extract_strided_slice %60 {offsets = [0, 0], sizes = [8, 32], strides = [1, 1]} : vector<8x128xf32> to vector<8x32xf32>
    %62 = vector.extract_strided_slice %60 {offsets = [0, 32], sizes = [8, 32], strides = [1, 1]} : vector<8x128xf32> to vector<8x32xf32>
    %63 = vector.extract_strided_slice %60 {offsets = [0, 64], sizes = [8, 32], strides = [1, 1]} : vector<8x128xf32> to vector<8x32xf32>
    %64 = vector.extract_strided_slice %60 {offsets = [0, 96], sizes = [8, 32], strides = [1, 1]} : vector<8x128xf32> to vector<8x32xf32>
    %65 = arith.mulf %62, %30 : vector<8x32xf32>
    %66 = arith.mulf %61, %63 : vector<8x32xf32>
    %67 = arith.addf %65, %66 : vector<8x32xf32>
    %68 = math.tanh %67 : vector<8x32xf32>
    %69 = arith.mulf %64, %68 : vector<8x32xf32>
    %c0_29 = arith.constant 0 : index
    %c0_30 = arith.constant 0 : index
    %70 = vector.load %arg8[%c0_29, %c0_30] : memref<8x256xf32, #tpu.memory_space<vmem>>, vector<8x32xf32>
    tpu.vector_store %arg8[%c0_29, %c0_30], %69 {strides = array<i32>} : memref<8x256xf32, #tpu.memory_space<vmem>>, vector<8x32xf32>,
    %71 = vector.extract_strided_slice %11 {offsets = [8, 0], sizes = [8, 128], strides = [1, 1]} : vector<64x128xf32> to vector<8x128xf32>
    %cst_31 = arith.constant dense<0.000000e+00> : vector<8x128xf32>
    %72 = tpu.matmul %49, %4, %cst_31 {dimension_numbers = #tpu.dot_dimension_numbers<[1], [0], [0], [1], [0, 0, 1, 1], [], []>} : vector<8x32xf32>, vector<32x128xf32>, vector<8x128xf32> -> vector<8x128xf32>
    %73 = arith.addf %71, %72 : vector<8x128xf32>
    %74 = arith.negf %73 : vector<8x128xf32>
    %75 = math.exp %74 : vector<8x128xf32>
    %cst_32 = arith.constant 1.000000e+00 : f32
    %76 = vector.broadcast %cst_32 : f32 to vector<8x128xf32>
    %77 = arith.addf %76, %75 : vector<8x128xf32>
    %78 = arith.divf %76, %77 : vector<8x128xf32>
    %79 = math.tanh %73 : vector<8x128xf32>
    %80 = arith.select %20, %79, %78 : vector<8x128xi1>, vector<8x128xf32>
    %81 = vector.extract_strided_slice %80 {offsets = [0, 0], sizes = [8, 32], strides = [1, 1]} : vector<8x128xf32> to vector<8x32xf32>
    %82 = vector.extract_strided_slice %80 {offsets = [0, 32], sizes = [8, 32], strides = [1, 1]} : vector<8x128xf32> to vector<8x32xf32>
    %83 = vector.extract_strided_slice %80 {offsets = [0, 64], sizes = [8, 32], strides = [1, 1]} : vector<8x128xf32> to vector<8x32xf32>
    %84 = vector.extract_strided_slice %80 {offsets = [0, 96], sizes = [8, 32], strides = [1, 1]} : vector<8x128xf32> to vector<8x32xf32>
    %85 = arith.mulf %82, %47 : vector<8x32xf32>
    %86 = arith.mulf %81, %83 : vector<8x32xf32>
    %87 = arith.addf %85, %86 : vector<8x32xf32>
    %88 = math.tanh %87 : vector<8x32xf32>
    %89 = arith.mulf %84, %88 : vector<8x32xf32>
    %cst_33 = arith.constant dense<0.000000e+00> : vector<8x128xf32>
    %90 = tpu.matmul %89, %5, %cst_33 {dimension_numbers = #tpu.dot_dimension_numbers<[1], [0], [0], [1], [0, 0, 1, 1], [], []>} : vector<8x32xf32>, vector<32x128xf32>, vector<8x128xf32> -> vector<8x128xf32>
    %cst_34 = arith.constant dense<0.000000e+00> : vector<8x128xf32>
    %91 = tpu.matmul %69, %6, %cst_34 {dimension_numbers = #tpu.dot_dimension_numbers<[1], [0], [0], [1], [0, 0, 1, 1], [], []>} : vector<8x32xf32>, vector<32x128xf32>, vector<8x128xf32> -> vector<8x128xf32>
    %92 = arith.addf %90, %91 : vector<8x128xf32>
    %93 = arith.addf %92, %14 : vector<8x128xf32>
    %94 = arith.negf %93 : vector<8x128xf32>
    %95 = math.exp %94 : vector<8x128xf32>
    %cst_35 = arith.constant 1.000000e+00 : f32
    %96 = vector.broadcast %cst_35 : f32 to vector<8x128xf32>
    %97 = arith.addf %96, %95 : vector<8x128xf32>
    %98 = arith.divf %96, %97 : vector<8x128xf32>
    %99 = math.tanh %93 : vector<8x128xf32>
    %100 = arith.select %26, %99, %98 : vector<8x128xi1>, vector<8x128xf32>
    %101 = vector.extract_strided_slice %100 {offsets = [0, 0], sizes = [8, 32], strides = [1, 1]} : vector<8x128xf32> to vector<8x32xf32>
    %102 = vector.extract_strided_slice %100 {offsets = [0, 32], sizes = [8, 32], strides = [1, 1]} : vector<8x128xf32> to vector<8x32xf32>
    %103 = vector.extract_strided_slice %100 {offsets = [0, 64], sizes = [8, 32], strides = [1, 1]} : vector<8x128xf32> to vector<8x32xf32>
    %104 = vector.extract_strided_slice %100 {offsets = [0, 96], sizes = [8, 32], strides = [1, 1]} : vector<8x128xf32> to vector<8x32xf32>
    %105 = arith.mulf %102, %67 : vector<8x32xf32>
    %106 = arith.mulf %101, %103 : vector<8x32xf32>
    %107 = arith.addf %105, %106 : vector<8x32xf32>
    %108 = math.tanh %107 : vector<8x32xf32>
    %109 = arith.mulf %104, %108 : vector<8x32xf32>
    %c0_36 = arith.constant 0 : index
    %c32 = arith.constant 32 : index
    %110 = vector.load %arg8[%c0_36, %c32] : memref<8x256xf32, #tpu.memory_space<vmem>>, vector<8x32xf32>
    tpu.vector_store %arg8[%c0_36, %c32], %109 {strides = array<i32>} : memref<8x256xf32, #tpu.memory_space<vmem>>, vector<8x32xf32>,
    %111 = vector.extract_strided_slice %11 {offsets = [16, 0], sizes = [8, 128], strides = [1, 1]} : vector<64x128xf32> to vector<8x128xf32>
    %cst_37 = arith.constant dense<0.000000e+00> : vector<8x128xf32>
    %112 = tpu.matmul %89, %4, %cst_37 {dimension_numbers = #tpu.dot_dimension_numbers<[1], [0], [0], [1], [0, 0, 1, 1], [], []>} : vector<8x32xf32>, vector<32x128xf32>, vector<8x128xf32> -> vector<8x128xf32>
    %113 = arith.addf %111, %112 : vector<8x128xf32>
    %114 = arith.negf %113 : vector<8x128xf32>
    %115 = math.exp %114 : vector<8x128xf32>
    %cst_38 = arith.constant 1.000000e+00 : f32
    %116 = vector.broadcast %cst_38 : f32 to vector<8x128xf32>
    %117 = arith.addf %116, %115 : vector<8x128xf32>
    %118 = arith.divf %116, %117 : vector<8x128xf32>
    %119 = math.tanh %113 : vector<8x128xf32>
    %120 = arith.select %20, %119, %118 : vector<8x128xi1>, vector<8x128xf32>
    %121 = vector.extract_strided_slice %120 {offsets = [0, 0], sizes = [8, 32], strides = [1, 1]} : vector<8x128xf32> to vector<8x32xf32>
    %122 = vector.extract_strided_slice %120 {offsets = [0, 32], sizes = [8, 32], strides = [1, 1]} : vector<8x128xf32> to vector<8x32xf32>
    %123 = vector.extract_strided_slice %120 {offsets = [0, 64], sizes = [8, 32], strides = [1, 1]} : vector<8x128xf32> to vector<8x32xf32>
    %124 = vector.extract_strided_slice %120 {offsets = [0, 96], sizes = [8, 32], strides = [1, 1]} : vector<8x128xf32> to vector<8x32xf32>
    %125 = arith.mulf %122, %87 : vector<8x32xf32>
    %126 = arith.mulf %121, %123 : vector<8x32xf32>
    %127 = arith.addf %125, %126 : vector<8x32xf32>
    %128 = math.tanh %127 : vector<8x32xf32>
    %129 = arith.mulf %124, %128 : vector<8x32xf32>
    %cst_39 = arith.constant dense<0.000000e+00> : vector<8x128xf32>
    %130 = tpu.matmul %129, %5, %cst_39 {dimension_numbers = #tpu.dot_dimension_numbers<[1], [0], [0], [1], [0, 0, 1, 1], [], []>} : vector<8x32xf32>, vector<32x128xf32>, vector<8x128xf32> -> vector<8x128xf32>
    %cst_40 = arith.constant dense<0.000000e+00> : vector<8x128xf32>
    %131 = tpu.matmul %109, %6, %cst_40 {dimension_numbers = #tpu.dot_dimension_numbers<[1], [0], [0], [1], [0, 0, 1, 1], [], []>} : vector<8x32xf32>, vector<32x128xf32>, vector<8x128xf32> -> vector<8x128xf32>
    %132 = arith.addf %130, %131 : vector<8x128xf32>
    %133 = arith.addf %132, %14 : vector<8x128xf32>
    %134 = arith.negf %133 : vector<8x128xf32>
    %135 = math.exp %134 : vector<8x128xf32>
    %cst_41 = arith.constant 1.000000e+00 : f32
    %136 = vector.broadcast %cst_41 : f32 to vector<8x128xf32>
    %137 = arith.addf %136, %135 : vector<8x128xf32>
    %138 = arith.divf %136, %137 : vector<8x128xf32>
    %139 = math.tanh %133 : vector<8x128xf32>
    %140 = arith.select %26, %139, %138 : vector<8x128xi1>, vector<8x128xf32>
    %141 = vector.extract_strided_slice %140 {offsets = [0, 0], sizes = [8, 32], strides = [1, 1]} : vector<8x128xf32> to vector<8x32xf32>
    %142 = vector.extract_strided_slice %140 {offsets = [0, 32], sizes = [8, 32], strides = [1, 1]} : vector<8x128xf32> to vector<8x32xf32>
    %143 = vector.extract_strided_slice %140 {offsets = [0, 64], sizes = [8, 32], strides = [1, 1]} : vector<8x128xf32> to vector<8x32xf32>
    %144 = vector.extract_strided_slice %140 {offsets = [0, 96], sizes = [8, 32], strides = [1, 1]} : vector<8x128xf32> to vector<8x32xf32>
    %145 = arith.mulf %142, %107 : vector<8x32xf32>
    %146 = arith.mulf %141, %143 : vector<8x32xf32>
    %147 = arith.addf %145, %146 : vector<8x32xf32>
    %148 = math.tanh %147 : vector<8x32xf32>
    %149 = arith.mulf %144, %148 : vector<8x32xf32>
    %c0_42 = arith.constant 0 : index
    %c64 = arith.constant 64 : index
    %150 = vector.load %arg8[%c0_42, %c64] : memref<8x256xf32, #tpu.memory_space<vmem>>, vector<8x32xf32>
    tpu.vector_store %arg8[%c0_42, %c64], %149 {strides = array<i32>} : memref<8x256xf32, #tpu.memory_space<vmem>>, vector<8x32xf32>,
    %151 = vector.extract_strided_slice %11 {offsets = [24, 0], sizes = [8, 128], strides = [1, 1]} : vector<64x128xf32> to vector<8x128xf32>
    %cst_43 = arith.constant dense<0.000000e+00> : vector<8x128xf32>
    %152 = tpu.matmul %129, %4, %cst_43 {dimension_numbers = #tpu.dot_dimension_numbers<[1], [0], [0], [1], [0, 0, 1, 1], [], []>} : vector<8x32xf32>, vector<32x128xf32>, vector<8x128xf32> -> vector<8x128xf32>
    %153 = arith.addf %151, %152 : vector<8x128xf32>
    %154 = arith.negf %153 : vector<8x128xf32>
    %155 = math.exp %154 : vector<8x128xf32>
    %cst_44 = arith.constant 1.000000e+00 : f32
    %156 = vector.broadcast %cst_44 : f32 to vector<8x128xf32>
    %157 = arith.addf %156, %155 : vector<8x128xf32>
    %158 = arith.divf %156, %157 : vector<8x128xf32>
    %159 = math.tanh %153 : vector<8x128xf32>
    %160 = arith.select %20, %159, %158 : vector<8x128xi1>, vector<8x128xf32>
    %161 = vector.extract_strided_slice %160 {offsets = [0, 0], sizes = [8, 32], strides = [1, 1]} : vector<8x128xf32> to vector<8x32xf32>
    %162 = vector.extract_strided_slice %160 {offsets = [0, 32], sizes = [8, 32], strides = [1, 1]} : vector<8x128xf32> to vector<8x32xf32>
    %163 = vector.extract_strided_slice %160 {offsets = [0, 64], sizes = [8, 32], strides = [1, 1]} : vector<8x128xf32> to vector<8x32xf32>
    %164 = vector.extract_strided_slice %160 {offsets = [0, 96], sizes = [8, 32], strides = [1, 1]} : vector<8x128xf32> to vector<8x32xf32>
    %165 = arith.mulf %162, %127 : vector<8x32xf32>
    %166 = arith.mulf %161, %163 : vector<8x32xf32>
    %167 = arith.addf %165, %166 : vector<8x32xf32>
    %168 = math.tanh %167 : vector<8x32xf32>
    %169 = arith.mulf %164, %168 : vector<8x32xf32>
    %cst_45 = arith.constant dense<0.000000e+00> : vector<8x128xf32>
    %170 = tpu.matmul %169, %5, %cst_45 {dimension_numbers = #tpu.dot_dimension_numbers<[1], [0], [0], [1], [0, 0, 1, 1], [], []>} : vector<8x32xf32>, vector<32x128xf32>, vector<8x128xf32> -> vector<8x128xf32>
    %cst_46 = arith.constant dense<0.000000e+00> : vector<8x128xf32>
    %171 = tpu.matmul %149, %6, %cst_46 {dimension_numbers = #tpu.dot_dimension_numbers<[1], [0], [0], [1], [0, 0, 1, 1], [], []>} : vector<8x32xf32>, vector<32x128xf32>, vector<8x128xf32> -> vector<8x128xf32>
    %172 = arith.addf %170, %171 : vector<8x128xf32>
    %173 = arith.addf %172, %14 : vector<8x128xf32>
    %174 = arith.negf %173 : vector<8x128xf32>
    %175 = math.exp %174 : vector<8x128xf32>
    %cst_47 = arith.constant 1.000000e+00 : f32
    %176 = vector.broadcast %cst_47 : f32 to vector<8x128xf32>
    %177 = arith.addf %176, %175 : vector<8x128xf32>
    %178 = arith.divf %176, %177 : vector<8x128xf32>
    %179 = math.tanh %173 : vector<8x128xf32>
    %180 = arith.select %26, %179, %178 : vector<8x128xi1>, vector<8x128xf32>
    %181 = vector.extract_strided_slice %180 {offsets = [0, 0], sizes = [8, 32], strides = [1, 1]} : vector<8x128xf32> to vector<8x32xf32>
    %182 = vector.extract_strided_slice %180 {offsets = [0, 32], sizes = [8, 32], strides = [1, 1]} : vector<8x128xf32> to vector<8x32xf32>
    %183 = vector.extract_strided_slice %180 {offsets = [0, 64], sizes = [8, 32], strides = [1, 1]} : vector<8x128xf32> to vector<8x32xf32>
    %184 = vector.extract_strided_slice %180 {offsets = [0, 96], sizes = [8, 32], strides = [1, 1]} : vector<8x128xf32> to vector<8x32xf32>
    %185 = arith.mulf %182, %147 : vector<8x32xf32>
    %186 = arith.mulf %181, %183 : vector<8x32xf32>
    %187 = arith.addf %185, %186 : vector<8x32xf32>
    %188 = math.tanh %187 : vector<8x32xf32>
    %189 = arith.mulf %184, %188 : vector<8x32xf32>
    %c0_48 = arith.constant 0 : index
    %c96 = arith.constant 96 : index
    %190 = vector.load %arg8[%c0_48, %c96] : memref<8x256xf32, #tpu.memory_space<vmem>>, vector<8x32xf32>
    tpu.vector_store %arg8[%c0_48, %c96], %189 {strides = array<i32>} : memref<8x256xf32, #tpu.memory_space<vmem>>, vector<8x32xf32>,
    %191 = vector.extract_strided_slice %11 {offsets = [32, 0], sizes = [8, 128], strides = [1, 1]} : vector<64x128xf32> to vector<8x128xf32>
    %cst_49 = arith.constant dense<0.000000e+00> : vector<8x128xf32>
    %192 = tpu.matmul %169, %4, %cst_49 {dimension_numbers = #tpu.dot_dimension_numbers<[1], [0], [0], [1], [0, 0, 1, 1], [], []>} : vector<8x32xf32>, vector<32x128xf32>, vector<8x128xf32> -> vector<8x128xf32>
    %193 = arith.addf %191, %192 : vector<8x128xf32>
    %194 = arith.negf %193 : vector<8x128xf32>
    %195 = math.exp %194 : vector<8x128xf32>
    %cst_50 = arith.constant 1.000000e+00 : f32
    %196 = vector.broadcast %cst_50 : f32 to vector<8x128xf32>
    %197 = arith.addf %196, %195 : vector<8x128xf32>
    %198 = arith.divf %196, %197 : vector<8x128xf32>
    %199 = math.tanh %193 : vector<8x128xf32>
    %200 = arith.select %20, %199, %198 : vector<8x128xi1>, vector<8x128xf32>
    %201 = vector.extract_strided_slice %200 {offsets = [0, 0], sizes = [8, 32], strides = [1, 1]} : vector<8x128xf32> to vector<8x32xf32>
    %202 = vector.extract_strided_slice %200 {offsets = [0, 32], sizes = [8, 32], strides = [1, 1]} : vector<8x128xf32> to vector<8x32xf32>
    %203 = vector.extract_strided_slice %200 {offsets = [0, 64], sizes = [8, 32], strides = [1, 1]} : vector<8x128xf32> to vector<8x32xf32>
    %204 = vector.extract_strided_slice %200 {offsets = [0, 96], sizes = [8, 32], strides = [1, 1]} : vector<8x128xf32> to vector<8x32xf32>
    %205 = arith.mulf %202, %167 : vector<8x32xf32>
    %206 = arith.mulf %201, %203 : vector<8x32xf32>
    %207 = arith.addf %205, %206 : vector<8x32xf32>
    %208 = math.tanh %207 : vector<8x32xf32>
    %209 = arith.mulf %204, %208 : vector<8x32xf32>
    %cst_51 = arith.constant dense<0.000000e+00> : vector<8x128xf32>
    %210 = tpu.matmul %209, %5, %cst_51 {dimension_numbers = #tpu.dot_dimension_numbers<[1], [0], [0], [1], [0, 0, 1, 1], [], []>} : vector<8x32xf32>, vector<32x128xf32>, vector<8x128xf32> -> vector<8x128xf32>
    %cst_52 = arith.constant dense<0.000000e+00> : vector<8x128xf32>
    %211 = tpu.matmul %189, %6, %cst_52 {dimension_numbers = #tpu.dot_dimension_numbers<[1], [0], [0], [1], [0, 0, 1, 1], [], []>} : vector<8x32xf32>, vector<32x128xf32>, vector<8x128xf32> -> vector<8x128xf32>
    %212 = arith.addf %210, %211 : vector<8x128xf32>
    %213 = arith.addf %212, %14 : vector<8x128xf32>
    %214 = arith.negf %213 : vector<8x128xf32>
    %215 = math.exp %214 : vector<8x128xf32>
    %cst_53 = arith.constant 1.000000e+00 : f32
    %216 = vector.broadcast %cst_53 : f32 to vector<8x128xf32>
    %217 = arith.addf %216, %215 : vector<8x128xf32>
    %218 = arith.divf %216, %217 : vector<8x128xf32>
    %219 = math.tanh %213 : vector<8x128xf32>
    %220 = arith.select %26, %219, %218 : vector<8x128xi1>, vector<8x128xf32>
    %221 = vector.extract_strided_slice %220 {offsets = [0, 0], sizes = [8, 32], strides = [1, 1]} : vector<8x128xf32> to vector<8x32xf32>
    %222 = vector.extract_strided_slice %220 {offsets = [0, 32], sizes = [8, 32], strides = [1, 1]} : vector<8x128xf32> to vector<8x32xf32>
    %223 = vector.extract_strided_slice %220 {offsets = [0, 64], sizes = [8, 32], strides = [1, 1]} : vector<8x128xf32> to vector<8x32xf32>
    %224 = vector.extract_strided_slice %220 {offsets = [0, 96], sizes = [8, 32], strides = [1, 1]} : vector<8x128xf32> to vector<8x32xf32>
    %225 = arith.mulf %222, %187 : vector<8x32xf32>
    %226 = arith.mulf %221, %223 : vector<8x32xf32>
    %227 = arith.addf %225, %226 : vector<8x32xf32>
    %228 = math.tanh %227 : vector<8x32xf32>
    %229 = arith.mulf %224, %228 : vector<8x32xf32>
    %c0_54 = arith.constant 0 : index
    %c128 = arith.constant 128 : index
    %230 = vector.load %arg8[%c0_54, %c128] : memref<8x256xf32, #tpu.memory_space<vmem>>, vector<8x32xf32>
    tpu.vector_store %arg8[%c0_54, %c128], %229 {strides = array<i32>} : memref<8x256xf32, #tpu.memory_space<vmem>>, vector<8x32xf32>,
    %231 = vector.extract_strided_slice %11 {offsets = [40, 0], sizes = [8, 128], strides = [1, 1]} : vector<64x128xf32> to vector<8x128xf32>
    %cst_55 = arith.constant dense<0.000000e+00> : vector<8x128xf32>
    %232 = tpu.matmul %209, %4, %cst_55 {dimension_numbers = #tpu.dot_dimension_numbers<[1], [0], [0], [1], [0, 0, 1, 1], [], []>} : vector<8x32xf32>, vector<32x128xf32>, vector<8x128xf32> -> vector<8x128xf32>
    %233 = arith.addf %231, %232 : vector<8x128xf32>
    %234 = arith.negf %233 : vector<8x128xf32>
    %235 = math.exp %234 : vector<8x128xf32>
    %cst_56 = arith.constant 1.000000e+00 : f32
    %236 = vector.broadcast %cst_56 : f32 to vector<8x128xf32>
    %237 = arith.addf %236, %235 : vector<8x128xf32>
    %238 = arith.divf %236, %237 : vector<8x128xf32>
    %239 = math.tanh %233 : vector<8x128xf32>
    %240 = arith.select %20, %239, %238 : vector<8x128xi1>, vector<8x128xf32>
    %241 = vector.extract_strided_slice %240 {offsets = [0, 0], sizes = [8, 32], strides = [1, 1]} : vector<8x128xf32> to vector<8x32xf32>
    %242 = vector.extract_strided_slice %240 {offsets = [0, 32], sizes = [8, 32], strides = [1, 1]} : vector<8x128xf32> to vector<8x32xf32>
    %243 = vector.extract_strided_slice %240 {offsets = [0, 64], sizes = [8, 32], strides = [1, 1]} : vector<8x128xf32> to vector<8x32xf32>
    %244 = vector.extract_strided_slice %240 {offsets = [0, 96], sizes = [8, 32], strides = [1, 1]} : vector<8x128xf32> to vector<8x32xf32>
    %245 = arith.mulf %242, %207 : vector<8x32xf32>
    %246 = arith.mulf %241, %243 : vector<8x32xf32>
    %247 = arith.addf %245, %246 : vector<8x32xf32>
    %248 = math.tanh %247 : vector<8x32xf32>
    %249 = arith.mulf %244, %248 : vector<8x32xf32>
    %cst_57 = arith.constant dense<0.000000e+00> : vector<8x128xf32>
    %250 = tpu.matmul %249, %5, %cst_57 {dimension_numbers = #tpu.dot_dimension_numbers<[1], [0], [0], [1], [0, 0, 1, 1], [], []>} : vector<8x32xf32>, vector<32x128xf32>, vector<8x128xf32> -> vector<8x128xf32>
    %cst_58 = arith.constant dense<0.000000e+00> : vector<8x128xf32>
    %251 = tpu.matmul %229, %6, %cst_58 {dimension_numbers = #tpu.dot_dimension_numbers<[1], [0], [0], [1], [0, 0, 1, 1], [], []>} : vector<8x32xf32>, vector<32x128xf32>, vector<8x128xf32> -> vector<8x128xf32>
    %252 = arith.addf %250, %251 : vector<8x128xf32>
    %253 = arith.addf %252, %14 : vector<8x128xf32>
    %254 = arith.negf %253 : vector<8x128xf32>
    %255 = math.exp %254 : vector<8x128xf32>
    %cst_59 = arith.constant 1.000000e+00 : f32
    %256 = vector.broadcast %cst_59 : f32 to vector<8x128xf32>
    %257 = arith.addf %256, %255 : vector<8x128xf32>
    %258 = arith.divf %256, %257 : vector<8x128xf32>
    %259 = math.tanh %253 : vector<8x128xf32>
    %260 = arith.select %26, %259, %258 : vector<8x128xi1>, vector<8x128xf32>
    %261 = vector.extract_strided_slice %260 {offsets = [0, 0], sizes = [8, 32], strides = [1, 1]} : vector<8x128xf32> to vector<8x32xf32>
    %262 = vector.extract_strided_slice %260 {offsets = [0, 32], sizes = [8, 32], strides = [1, 1]} : vector<8x128xf32> to vector<8x32xf32>
    %263 = vector.extract_strided_slice %260 {offsets = [0, 64], sizes = [8, 32], strides = [1, 1]} : vector<8x128xf32> to vector<8x32xf32>
    %264 = vector.extract_strided_slice %260 {offsets = [0, 96], sizes = [8, 32], strides = [1, 1]} : vector<8x128xf32> to vector<8x32xf32>
    %265 = arith.mulf %262, %227 : vector<8x32xf32>
    %266 = arith.mulf %261, %263 : vector<8x32xf32>
    %267 = arith.addf %265, %266 : vector<8x32xf32>
    %268 = math.tanh %267 : vector<8x32xf32>
    %269 = arith.mulf %264, %268 : vector<8x32xf32>
    %c0_60 = arith.constant 0 : index
    %c160 = arith.constant 160 : index
    %270 = vector.load %arg8[%c0_60, %c160] : memref<8x256xf32, #tpu.memory_space<vmem>>, vector<8x32xf32>
    tpu.vector_store %arg8[%c0_60, %c160], %269 {strides = array<i32>} : memref<8x256xf32, #tpu.memory_space<vmem>>, vector<8x32xf32>,
    %271 = vector.extract_strided_slice %11 {offsets = [48, 0], sizes = [8, 128], strides = [1, 1]} : vector<64x128xf32> to vector<8x128xf32>
    %cst_61 = arith.constant dense<0.000000e+00> : vector<8x128xf32>
    %272 = tpu.matmul %249, %4, %cst_61 {dimension_numbers = #tpu.dot_dimension_numbers<[1], [0], [0], [1], [0, 0, 1, 1], [], []>} : vector<8x32xf32>, vector<32x128xf32>, vector<8x128xf32> -> vector<8x128xf32>
    %273 = arith.addf %271, %272 : vector<8x128xf32>
    %274 = arith.negf %273 : vector<8x128xf32>
    %275 = math.exp %274 : vector<8x128xf32>
    %cst_62 = arith.constant 1.000000e+00 : f32
    %276 = vector.broadcast %cst_62 : f32 to vector<8x128xf32>
    %277 = arith.addf %276, %275 : vector<8x128xf32>
    %278 = arith.divf %276, %277 : vector<8x128xf32>
    %279 = math.tanh %273 : vector<8x128xf32>
    %280 = arith.select %20, %279, %278 : vector<8x128xi1>, vector<8x128xf32>
    %281 = vector.extract_strided_slice %280 {offsets = [0, 0], sizes = [8, 32], strides = [1, 1]} : vector<8x128xf32> to vector<8x32xf32>
    %282 = vector.extract_strided_slice %280 {offsets = [0, 32], sizes = [8, 32], strides = [1, 1]} : vector<8x128xf32> to vector<8x32xf32>
    %283 = vector.extract_strided_slice %280 {offsets = [0, 64], sizes = [8, 32], strides = [1, 1]} : vector<8x128xf32> to vector<8x32xf32>
    %284 = vector.extract_strided_slice %280 {offsets = [0, 96], sizes = [8, 32], strides = [1, 1]} : vector<8x128xf32> to vector<8x32xf32>
    %285 = arith.mulf %282, %247 : vector<8x32xf32>
    %286 = arith.mulf %281, %283 : vector<8x32xf32>
    %287 = arith.addf %285, %286 : vector<8x32xf32>
    %288 = math.tanh %287 : vector<8x32xf32>
    %289 = arith.mulf %284, %288 : vector<8x32xf32>
    %cst_63 = arith.constant dense<0.000000e+00> : vector<8x128xf32>
    %290 = tpu.matmul %289, %5, %cst_63 {dimension_numbers = #tpu.dot_dimension_numbers<[1], [0], [0], [1], [0, 0, 1, 1], [], []>} : vector<8x32xf32>, vector<32x128xf32>, vector<8x128xf32> -> vector<8x128xf32>
    %cst_64 = arith.constant dense<0.000000e+00> : vector<8x128xf32>
    %291 = tpu.matmul %269, %6, %cst_64 {dimension_numbers = #tpu.dot_dimension_numbers<[1], [0], [0], [1], [0, 0, 1, 1], [], []>} : vector<8x32xf32>, vector<32x128xf32>, vector<8x128xf32> -> vector<8x128xf32>
    %292 = arith.addf %290, %291 : vector<8x128xf32>
    %293 = arith.addf %292, %14 : vector<8x128xf32>
    %294 = arith.negf %293 : vector<8x128xf32>
    %295 = math.exp %294 : vector<8x128xf32>
    %cst_65 = arith.constant 1.000000e+00 : f32
    %296 = vector.broadcast %cst_65 : f32 to vector<8x128xf32>
    %297 = arith.addf %296, %295 : vector<8x128xf32>
    %298 = arith.divf %296, %297 : vector<8x128xf32>
    %299 = math.tanh %293 : vector<8x128xf32>
    %300 = arith.select %26, %299, %298 : vector<8x128xi1>, vector<8x128xf32>
    %301 = vector.extract_strided_slice %300 {offsets = [0, 0], sizes = [8, 32], strides = [1, 1]} : vector<8x128xf32> to vector<8x32xf32>
    %302 = vector.extract_strided_slice %300 {offsets = [0, 32], sizes = [8, 32], strides = [1, 1]} : vector<8x128xf32> to vector<8x32xf32>
    %303 = vector.extract_strided_slice %300 {offsets = [0, 64], sizes = [8, 32], strides = [1, 1]} : vector<8x128xf32> to vector<8x32xf32>
    %304 = vector.extract_strided_slice %300 {offsets = [0, 96], sizes = [8, 32], strides = [1, 1]} : vector<8x128xf32> to vector<8x32xf32>
    %305 = arith.mulf %302, %267 : vector<8x32xf32>
    %306 = arith.mulf %301, %303 : vector<8x32xf32>
    %307 = arith.addf %305, %306 : vector<8x32xf32>
    %308 = math.tanh %307 : vector<8x32xf32>
    %309 = arith.mulf %304, %308 : vector<8x32xf32>
    %c0_66 = arith.constant 0 : index
    %c192 = arith.constant 192 : index
    %310 = vector.load %arg8[%c0_66, %c192] : memref<8x256xf32, #tpu.memory_space<vmem>>, vector<8x32xf32>
    tpu.vector_store %arg8[%c0_66, %c192], %309 {strides = array<i32>} : memref<8x256xf32, #tpu.memory_space<vmem>>, vector<8x32xf32>,
    %311 = vector.extract_strided_slice %11 {offsets = [56, 0], sizes = [8, 128], strides = [1, 1]} : vector<64x128xf32> to vector<8x128xf32>
    %cst_67 = arith.constant dense<0.000000e+00> : vector<8x128xf32>
    %312 = tpu.matmul %289, %4, %cst_67 {dimension_numbers = #tpu.dot_dimension_numbers<[1], [0], [0], [1], [0, 0, 1, 1], [], []>} : vector<8x32xf32>, vector<32x128xf32>, vector<8x128xf32> -> vector<8x128xf32>
    %313 = arith.addf %311, %312 : vector<8x128xf32>
    %314 = arith.negf %313 : vector<8x128xf32>
    %315 = math.exp %314 : vector<8x128xf32>
    %cst_68 = arith.constant 1.000000e+00 : f32
    %316 = vector.broadcast %cst_68 : f32 to vector<8x128xf32>
    %317 = arith.addf %316, %315 : vector<8x128xf32>
    %318 = arith.divf %316, %317 : vector<8x128xf32>
    %319 = math.tanh %313 : vector<8x128xf32>
    %320 = arith.select %20, %319, %318 : vector<8x128xi1>, vector<8x128xf32>
    %321 = vector.extract_strided_slice %320 {offsets = [0, 0], sizes = [8, 32], strides = [1, 1]} : vector<8x128xf32> to vector<8x32xf32>
    %322 = vector.extract_strided_slice %320 {offsets = [0, 32], sizes = [8, 32], strides = [1, 1]} : vector<8x128xf32> to vector<8x32xf32>
    %323 = vector.extract_strided_slice %320 {offsets = [0, 64], sizes = [8, 32], strides = [1, 1]} : vector<8x128xf32> to vector<8x32xf32>
    %324 = vector.extract_strided_slice %320 {offsets = [0, 96], sizes = [8, 32], strides = [1, 1]} : vector<8x128xf32> to vector<8x32xf32>
    %325 = arith.mulf %322, %287 : vector<8x32xf32>
    %326 = arith.mulf %321, %323 : vector<8x32xf32>
    %327 = arith.addf %325, %326 : vector<8x32xf32>
    %328 = math.tanh %327 : vector<8x32xf32>
    %329 = arith.mulf %324, %328 : vector<8x32xf32>
    %cst_69 = arith.constant dense<0.000000e+00> : vector<8x128xf32>
    %330 = tpu.matmul %329, %5, %cst_69 {dimension_numbers = #tpu.dot_dimension_numbers<[1], [0], [0], [1], [0, 0, 1, 1], [], []>} : vector<8x32xf32>, vector<32x128xf32>, vector<8x128xf32> -> vector<8x128xf32>
    %cst_70 = arith.constant dense<0.000000e+00> : vector<8x128xf32>
    %331 = tpu.matmul %309, %6, %cst_70 {dimension_numbers = #tpu.dot_dimension_numbers<[1], [0], [0], [1], [0, 0, 1, 1], [], []>} : vector<8x32xf32>, vector<32x128xf32>, vector<8x128xf32> -> vector<8x128xf32>
    %332 = arith.addf %330, %331 : vector<8x128xf32>
    %333 = arith.addf %332, %14 : vector<8x128xf32>
    %334 = arith.negf %333 : vector<8x128xf32>
    %335 = math.exp %334 : vector<8x128xf32>
    %cst_71 = arith.constant 1.000000e+00 : f32
    %336 = vector.broadcast %cst_71 : f32 to vector<8x128xf32>
    %337 = arith.addf %336, %335 : vector<8x128xf32>
    %338 = arith.divf %336, %337 : vector<8x128xf32>
    %339 = math.tanh %333 : vector<8x128xf32>
    %340 = arith.select %26, %339, %338 : vector<8x128xi1>, vector<8x128xf32>
    %341 = vector.extract_strided_slice %340 {offsets = [0, 0], sizes = [8, 32], strides = [1, 1]} : vector<8x128xf32> to vector<8x32xf32>
    %342 = vector.extract_strided_slice %340 {offsets = [0, 32], sizes = [8, 32], strides = [1, 1]} : vector<8x128xf32> to vector<8x32xf32>
    %343 = vector.extract_strided_slice %340 {offsets = [0, 64], sizes = [8, 32], strides = [1, 1]} : vector<8x128xf32> to vector<8x32xf32>
    %344 = vector.extract_strided_slice %340 {offsets = [0, 96], sizes = [8, 32], strides = [1, 1]} : vector<8x128xf32> to vector<8x32xf32>
    %345 = arith.mulf %342, %307 : vector<8x32xf32>
    %346 = arith.mulf %341, %343 : vector<8x32xf32>
    %347 = arith.addf %345, %346 : vector<8x32xf32>
    %348 = math.tanh %347 : vector<8x32xf32>
    %349 = arith.mulf %344, %348 : vector<8x32xf32>
    %c0_72 = arith.constant 0 : index
    %c224 = arith.constant 224 : index
    %350 = vector.load %arg8[%c0_72, %c224] : memref<8x256xf32, #tpu.memory_space<vmem>>, vector<8x32xf32>
    tpu.vector_store %arg8[%c0_72, %c224], %349 {strides = array<i32>} : memref<8x256xf32, #tpu.memory_space<vmem>>, vector<8x32xf32>,
    %c0_73 = arith.constant 0 : index
    %c0_74 = arith.constant 0 : index
    %351 = vector.load %arg9[%c0_73, %c0_74] : memref<8x32xf32, #tpu.memory_space<vmem>>, vector<8x32xf32>
    tpu.vector_store %arg9[%c0_73, %c0_74], %329 {strides = array<i32>} : memref<8x32xf32, #tpu.memory_space<vmem>>, vector<8x32xf32>,
    %c0_75 = arith.constant 0 : index
    %c0_76 = arith.constant 0 : index
    %352 = vector.load %arg10[%c0_75, %c0_76] : memref<8x32xf32, #tpu.memory_space<vmem>>, vector<8x32xf32>
    tpu.vector_store %arg10[%c0_75, %c0_76], %327 {strides = array<i32>} : memref<8x32xf32, #tpu.memory_space<vmem>>, vector<8x32xf32>,
    %c0_77 = arith.constant 0 : index
    %c0_78 = arith.constant 0 : index
    %353 = vector.load %arg11[%c0_77, %c0_78] : memref<8x32xf32, #tpu.memory_space<vmem>>, vector<8x32xf32>
    tpu.vector_store %arg11[%c0_77, %c0_78], %349 {strides = array<i32>} : memref<8x32xf32, #tpu.memory_space<vmem>>, vector<8x32xf32>,
    %c0_79 = arith.constant 0 : index
    %c0_80 = arith.constant 0 : index
    %354 = vector.load %arg12[%c0_79, %c0_80] : memref<8x32xf32, #tpu.memory_space<vmem>>, vector<8x32xf32>
    tpu.vector_store %arg12[%c0_79, %c0_80], %347 {strides = array<i32>} : memref<8x32xf32, #tpu.memory_space<vmem>>, vector<8x32xf32>,
    return
  }
  func.func @transform_0(%arg0: i32) -> (i32, i32) {
    %c0_i32 = arith.constant 0 : i32
    %c0_i32_0 = arith.constant 0 : i32
    return %arg0, %c0_i32 : i32, i32
  }
  func.func @transform_1(%arg0: i32) -> (i32, i32) {
    %c0_i32 = arith.constant 0 : i32
    %c0_i32_0 = arith.constant 0 : i32
    %c0_i32_1 = arith.constant 0 : i32
    return %c0_i32, %c0_i32_0 : i32, i32
  }
  func.func @transform_2(%arg0: i32) -> (i32, i32) {
    %c0_i32 = arith.constant 0 : i32
    %c0_i32_0 = arith.constant 0 : i32
    %c0_i32_1 = arith.constant 0 : i32
    return %c0_i32, %c0_i32_0 : i32, i32
  }
  func.func @transform_3(%arg0: i32) -> (i32, i32) {
    %c0_i32 = arith.constant 0 : i32
    %c0_i32_0 = arith.constant 0 : i32
    %c0_i32_1 = arith.constant 0 : i32
    return %c0_i32, %c0_i32_0 : i32, i32
  }
  func.func @transform_4(%arg0: i32) -> (i32, i32) {
    %c0_i32 = arith.constant 0 : i32
    %c0_i32_0 = arith.constant 0 : i32
    %c0_i32_1 = arith.constant 0 : i32
    return %c0_i32, %c0_i32_0 : i32, i32
  }
  func.func @transform_5(%arg0: i32) -> (i32, i32) {
    %c0_i32 = arith.constant 0 : i32
    %c0_i32_0 = arith.constant 0 : i32
    %c0_i32_1 = arith.constant 0 : i32
    return %c0_i32, %c0_i32_0 : i32, i32
  }
  func.func @transform_6(%arg0: i32) -> (i32, i32) {
    %c0_i32 = arith.constant 0 : i32
    %c0_i32_0 = arith.constant 0 : i32
    %c0_i32_1 = arith.constant 0 : i32
    return %c0_i32, %c0_i32_0 : i32, i32
  }
  func.func @transform_7(%arg0: i32) -> (i32, i32) {
    %c0_i32 = arith.constant 0 : i32
    %c0_i32_0 = arith.constant 0 : i32
    return %c0_i32, %arg0 : i32, i32
  }
}

</mosaic_0001>

<bundles_post_ra>
// kernel: tpu_custom_call.1
= control target key start
LH: loop header
LB: loop body
LE: loop exit
PB: predicated region body
PF: predicated region fallthrough
CT: control target
= control target key end

     0   :  { %12 = vsyncpa [#allocation7], 0  ;;  %s3814_s0 = inlined_call_operand.vmem [shape: f32[64,4], index: 0, kind: input, shape index: {}]   ;;  %s3815_s1 = inlined_call_operand.vmem [shape: f32[4,128], index: 1, kind: input, shape index: {}]   ;;  %s3816_s2 = inlined_call_operand.vmem [shape: f32[32,128], index: 2, kind: input, shape index: {}]   ;;  %s3817_s3 = inlined_call_operand.vmem [shape: f32[1,128], index: 3, kind: input, shape index: {}]   ;;  %s3818_s4 = inlined_call_operand.vmem [shape: f32[32,128], index: 4, kind: input, shape index: {}]   ;;  %s3819_s5 = inlined_call_operand.hbm [shape: f32[32,128], index: 5, kind: input, shape index: {}]   ;;  %s3820_s6 = inlined_call_operand.vmem [shape: f32[1,128], index: 6, kind: input, shape index: {}]   ;;  %s3821_s7 = inlined_call_operand.hbm [shape: f32[8,256], index: 7, kind: output, shape index: {}]  }
   0x1   :  { %13 = vsyncpa [#allocation8], 0  ;;  %s3260_s24 = smov [#allocation6]   ;;  %s3212_s28 = scalar_lea.hbm %s3819_s5, 512 }
   0x2   :  { %s29_s25 = sshll.u32 %s3260_s24, 4  ;;  %p3213_p0 = scmp.ne.s32.totalorder %s3819_s5, %s3212_s28  ;;  %s30_s25 = int_to_ptr.vmem [resolvable:$true] %s29_s25 }
   0x3   :  { %p3216_p1 = scmp.lt.u32.totalorder %s3212_s28, %s3819_s5 }
   0x5   :  { %p3218_p2 = pnand %p3216_p1, %p3213_p0 }
   0x7   :  { %3221 = shalt.err (!%p3218_p2)
}
   0x8   :  { %s3222_s10 = scalar_lea.vmem %s30_s25, 512  ;;  %p3227_p4 = scmp.lt.s32.totalorder %s30_s25, %s30_s25 }
   0x9   :  { %p3223_p3 = scmp.ne.s32.totalorder %s30_s25, %s3222_s10  ;;  %p3228_p5 = scmp.lt.s32.totalorder %s3222_s10, %s3222_s10 }
   0xb   :  { %p3229_p6 = por %p3228_p5, %p3227_p4 }
   0xd   :  { %p3230_p7 = pnand %p3229_p6, %p3223_p3 }
   0xf   :  { %3233 = shalt.err (!%p3230_p7)
}
  0x10   :  { %s3261_s11 = smov 128   ;;  %s3262_s12 = smov 8  }
  0x11   :  { %35 = dma.hbm_to_vmem [thread:$0]  %s3819_s5, 512, %s30_s25, [#allocation7], %s3261_s11, %s3261_s11, %s3262_s12  }
  0x12   :  { %3256 = dma.done.wait [#allocation7], 512  }
  0x13   :  { %3257 = vsyncadd [#allocation7], 4294966784  ;;  %v3263_v0 = vmov 0.0|0.0   ;;  %vm45_vm0 = vcmask 261120   ;;  %vm3264_vm1 = vmmov 0   ;;  %v3265_v1 = vmov 0.0  }
  0x14   :  { %2929 = vmatprep.subr.bf16.mxu1 %v3263_v0  ;;  %2673 = vmatprep.mubr.msk.f32.mxu1 %vm3264_vm1, %v3265_v1  ;;  %46 = vst.msk [vmem:[#allocation2] sm:$0xff] %vm45_vm0, %v3265_v1  ;;  %47 = vst.msk [vmem:[#allocation3] sm:$0xff] %vm45_vm0, %v3265_v1  ;;  %vm103_vm2 = vcmask 1043456   ;;  %vm78_vm3 = vcmask 31744   ;;  %v51_v2 = vld [vmem:[%s3816_s2] sm:$0xff]  ;;  %v52_v3 = vld [vmem:[%s3816_s2 + $0x8] sm:$0xff]  ;;  %v219_v21 = vlaneseq }
  0x15   :  { %48 = vst.msk [vmem:[#allocation4] sm:$0xff] %vm45_vm0, %v3265_v1  ;;  %49 = vst.msk [vmem:[#allocation5] sm:$0xff] %vm45_vm0, %v3265_v1  ;;  %v50_v4 = vld [vmem:[%s3815_s1] sm:$0xf]  ;;  %v3342_v5 = vpack.c.bf16 %v52_v3, %v51_v2  ;;  %v64_v7 = vld [vmem:[%s3814_s0 + $0x8] sm:$0xff]  ;;  %s3266_s28 = smov 64  }
  0x16   :  { %2651 = vmatprep.subr.msk.mxu0 %vm103_vm2, %v50_v4  ;;  %v63_v6 = vld [vmem:[%s3814_s0] sm:$0xff]  ;;  %v53_v8 = vld [vmem:[%s3816_s2 + $0x10] sm:$0xff]  ;;  %v54_v9 = vld [vmem:[%s3816_s2 + $0x18] sm:$0xff]  ;;  %v220_v23 = vand.u32 127, %v219_v21  ;;  %s3267_s29 = smov 32   ;;  %vm788_vm7 = vcmask 523520  }
  0x17   :  { %2652 = vmatpush3.msk.msra.mxu0 %vm103_vm2, %v50_v4  ;;  %2653 = vmatprep.mubr.msk.f32.mxu0 %vm78_vm3, %v63_v6  ;;  %v3359_v10 = vpack.c.bf16 %v54_v9, %v53_v8  ;;  %v3373_v13 = vld [vmem:[%s3817_s3] ss:$0 sm:$0xff]  ;;  %v56_v36 = vld [vmem:[%s3818_s4 + $0x8] sm:$0xff]  ;;  %v65_v40 = vld [vmem:[%s3814_s0 + $0x10] sm:$0xff]  ;;  %vm1065_vm8 = vcmask 785920   ;;  %vm1338_vm9 = vcmask 1048320  }
  0x18   :  { %2931 = vmatpush3.bf16.msra.mxu1 %v3342_v5  ;;  %2654 = vmatmul.mubr.msk.f32.vlgmr.msra.gmra.mrb[0].mxu0 %vm78_vm3, %v64_v7  ;;  %vm221_vm4 = vcmp.ge.s32.totalorder %v220_v23, 64  ;;  %vm222_vm5 = vcmp.lt.s32.totalorder %v220_v23, 96  ;;  %v55_v35 = vld [vmem:[%s3818_s4] sm:$0xff]  ;;  %v60_v39 = vld [vmem:[#allocation6 + $0x8] sm:$0xff]  ;;  %v66_v41 = vld [vmem:[%s3814_s0 + $0x18] sm:$0xff]  ;;  %s3269_s1 = smov [#allocation9]  }
  0x19   :  { %2932 = vmatprep.subr.bf16.mxu1 %v3263_v0  ;;  %2941 = vmatprep.subr.bf16.mxu0 %v3263_v0  ;;  %vm3376_vm6 = vmand %vm221_vm4, %vm222_vm5  ;;  %v59_v37 = vld [vmem:[#allocation6] sm:$0xff]  ;;  %v3394_v38 = vpack.c.bf16 %v56_v36, %v55_v35  ;;  %v61_v43 = vld [vmem:[#allocation6 + $0x10] sm:$0xff]  ;;  %s2462_s2 = sshll.u32 %s3269_s1, 4  ;;  %s2463_s2 = int_to_ptr.vmem [resolvable:$true] %s2462_s2 }
  0x1a   :  { %v3402_v42 = vpack.c.bf16 %v60_v39, %v59_v37  ;;  %2656 = vmatprep.mubr.msk.f32.mxu0 %vm78_vm3, %v65_v40  ;;  %v62_v44 = vld [vmem:[#allocation6 + $0x18] sm:$0xff]  ;;  %v67_v45 = vld [vmem:[%s3814_s0 + $0x20] sm:$0xff]  ;;  %v57_v46 = vld [vmem:[%s3818_s4 + $0x10] sm:$0xff]  ;;  %s3234_s27 = scalar_lea.vmem %s2463_s2, 256  ;;  %p3239_p9 = scmp.lt.s32.totalorder %s2463_s2, %s2463_s2 }
  0x1b   :  { %v224_v11 = vld [vmem:[#allocation2] sm:$0xff]  ;;  %v225_v28 = vld [vmem:[#allocation3] sm:$0xff]  ;;  %2943 = vmatpush3.bf16.msra.mxu0 %v3394_v38  ;;  %v58_v47 = vld [vmem:[%s3818_s4 + $0x18] sm:$0xff]  ;;  %v3417_v48 = vpack.c.bf16 %v62_v44, %v61_v43  ;;  %p3235_p8 = scmp.ne.s32.totalorder %s2463_s2, %s3234_s27  ;;  %p3240_p10 = scmp.lt.s32.totalorder %s3234_s27, %s3234_s27 }
  0x1c   :  { %2934 = vmatpush3.bf16.msra.mxu1 %v3359_v10  ;;  %2657 = vmatmul.mubr.msk.f32.gmra.mrb[2].mxu0 %vm78_vm3, %v66_v41  ;;  %v3419_v49 = vpack.c.bf16 %v58_v47, %v57_v46  ;;  %v68_v50 = vld [vmem:[%s3814_s0 + $0x28] sm:$0xff]  ;;  %v69_v51 = vld [vmem:[%s3814_s0 + $0x30] sm:$0xff]  ;;  %v70_v53 = vld [vmem:[%s3814_s0 + $0x38] sm:$0xff] }
  0x1d   :  { %2935 = vmatprep.subr.bf16.mxu1 %v3263_v0  ;;  %2659 = vmatprep.mubr.msk.f32.mxu0 %vm78_vm3, %v67_v45  ;;  %v226_v52 = vld [vmem:[#allocation4] sm:$0xff]  ;;  %v3482_v6 = vld [vmem:[%s3820_s6] ss:$0 sm:$0xff]  ;;  %p3241_p11 = por %p3240_p10, %p3239_p9 }
  0x1e   :  { %2944 = vmatprep.subr.bf16.mxu0 %v3263_v0 }
  0x1f   :  { %2674 = vmatmul.mubr.msk.f32.vlgmr.msra.gmra.mrb[0].mxu1 %vm45_vm0, %v224_v11  ;;  %2946 = vmatpush3.bf16.msra.mxu0 %v3419_v49  ;;  %p3242_p12 = pnand %p3241_p11, %p3235_p8 }
  0x20   :  { %2684 = vmatprep.mubr.msk.f32.mxu1 %vm3264_vm1, %v3265_v1  ;;  %2937 = vmatpush3.bf16.msra.mxu1 %v3402_v42 }
  0x21   :  { %2938 = vmatprep.subr.bf16.mxu1 %v3263_v0  ;;  %2660 = vmatmul.mubr.msk.f32.gmra.mrb[4].mxu0 %vm78_vm3, %v68_v50 }
  0x22   :  { %2662 = vmatprep.mubr.msk.f32.mxu0 %vm78_vm3, %v69_v51  ;;  %2953 = vmatprep.subr.bf16.mxu0 %v3263_v0 }
  0x24   :  { %2940 = vmatpush3.bf16.msra.mxu1 %v3417_v48 }
  0x25   :  { %2947 = vmatprep.subr.bf16.mxu1 %v3263_v0  ;;  %2663 = vmatmul.mubr.msk.f32.gmra.mrb[6].mxu0 %vm78_vm3, %v70_v53 }
  0x26   :  { %2695 = vmatprep.mubr.msk.f32.mxu0 %vm3264_vm1, %v3265_v1 }
  0x27   :  { %2685 = vmatmul.mubr.msk.f32.vlgmr.msra.gmra.mrb[2].mxu1 %vm45_vm0, %v226_v52 }
  0x28   :  { %2949 = vmatpush3.bf16.msra.mxu1 %v3342_v5  ;;  %2706 = vmatprep.mubr.msk.f32.mxu1 %vm3264_vm1, %v3265_v1 }
  0x29   :  { %2950 = vmatprep.subr.bf16.mxu1 %v3263_v0 }
  0x2c   :  { %2952 = vmatpush3.bf16.msra.mxu1 %v3359_v10 }
  0x2d   :  { %2959 = vmatprep.subr.bf16.mxu1 %v3263_v0 }
  0xeb   :  { %v3368_v12 = vpop.f32.mrb[0].mxu0 }
  0xec   :  { %v173_v14 = vpop.f32.mrb[1].mxu0  ;;  %v179_v4 = vadd.f32 %v3368_v12, %v3373_v13 }
  0xed   :  { %v174_v15 = vadd.f32 %v3373_v13, %v173_v14 }
  0xef   :  { %v3451_v57 = vpop.f32.mrb[2].mxu0 }
  0xf0   :  { %v3453_v58 = vpop.f32.mrb[3].mxu0 }
  0xf2   :  { %v298_v16 = vpop.f32.mrb[0].mxu1 }
  0xf3   :  { %v302_v17 = vadd.f32 %v298_v16, %v174_v15  ;;  %v2675_v18 = vpop.f32.mrb[1].mxu1 }
  0xf4   :  { %v3455_v59 = vpop.f32.mrb[4].mxu0 }
  0xf5   :  { %v2483_v19 = vmul.f32 -1.442695, %v302_v17  ;;  %v3457_v60 = vpop.f32.mrb[5].mxu0 }
  0xf7   :  { %3083 = vpow2.f32 %v2483_v19 }
  0xf8   :  { %3085 = vtanh.f32 %v302_v17  ;;  %v3459_v62 = vpop.f32.mrb[6].mxu0 }
  0xf9   :  { %v3461_v2 = vpop.f32.mrb[7].mxu0 }
  0xfa   :  { %v401_v61 = vpop.f32.mrb[2].mxu1 }
  0xfb   :  { %v2686_v63 = vpop.f32.mrb[3].mxu1 }
 0x101   :  { %v3084_v20 = vpop.eup %3083 }
 0x102   :  { %v306_v22 = vadd.f32 1.0, %v3084_v20  ;;  %v3086_v25 = vpop.eup %3085 }
 0x104   :  { %3087 = vrcp.f32 %v306_v22 }
 0x10e   :  { %v3088_v26 = vpop.eup %3087 }
 0x10f   :  { %v310_v27 = vsel %vm3376_vm6, %v3086_v25, %v3088_v26 }
 0x110   :  { %317 = vrot.lane.b32.xlu0 %v310_v27, %s3266_s28 }
 0x114   :  { %312 = vrot.lane.b32.xlu0 %v225_v28, %s3267_s29 }
 0x182   :  { %v318_v29 = vpop.permute.xlu0 %317 }
 0x183   :  { %v320_v30 = vmul.f32 %v318_v29, %v310_v27  ;;  %v227_v29 = vld [vmem:[#allocation5] sm:$0xff] }
 0x185   :  { %322 = vrot.lane.b32.xlu1 %v320_v30, %s3267_s29 }
 0x186   :  { %v313_v31 = vpop.permute.xlu0 %312 }
 0x187   :  { %v315_v32 = vmul.f32 %v313_v31, %v310_v27 }
 0x1f7   :  { %v323_v33 = vpop.permute.xlu1 %322 }
 0x1f8   :  { %v3385_v34 = vadd.f32 %v323_v33, %v315_v32 }
 0x1fa   :  { %3089 = vtanh.f32 %v3385_v34 }
 0x204   :  { %v3090_v54 = vpop.eup %3089 }
 0x205   :  { %328 = vrot.lane.b32.xlu1 %v3090_v54, %s3266_s28 }
 0x277   :  { %v329_v55 = vpop.permute.xlu1 %328 }
 0x278   :  { %v331_v56 = vmul.f32 %v329_v55, %v310_v27 }
 0x27a   :  { %406 = vrot.lane.b32.xlu0 %v331_v56, %s3267_s29 }
 0x2ec   :  { %v407_v3 = vpop.permute.xlu0 %406 }
 0x2ed   :  { %2696 = vmatmul.mubr.msk.f32.vlgmr.msra.gmra.mrb[8].mxu0 %vm45_vm0, %v407_v3  ;;  %2707 = vmatmul.mubr.msk.f32.vlgmr.msra.gmra.mrb[4].mxu1 %vm45_vm0, %v407_v3 }
 0x2ee   :  { %2961 = vmatpush3.bf16.msra.mxu1 %v3394_v38  ;;  %2955 = vmatpush3.bf16.msra.mxu0 %v3402_v42 }
 0x2ef   :  { %2962 = vmatprep.subr.bf16.mxu1 %v3263_v0  ;;  %2956 = vmatprep.subr.bf16.mxu0 %v3263_v0 }
 0x2f0   :  { %2728 = vmatprep.mubr.msk.f32.mxu1 %vm3264_vm1, %v3265_v1  ;;  %2717 = vmatprep.mubr.msk.f32.mxu0 %vm3264_vm1, %v3265_v1 }
 0x2f2   :  { %2964 = vmatpush3.bf16.msra.mxu1 %v3419_v49  ;;  %2958 = vmatpush3.bf16.msra.mxu0 %v3417_v48 }
 0x2f3   :  { %2965 = vmatprep.subr.bf16.mxu0 %v3263_v0  ;;  %2971 = vmatprep.subr.bf16.mxu1 %v3263_v0 }
 0x3c0   :  { %v476_v7 = vpop.f32.mrb[8].mxu0  ;;  %v581_v8 = vpop.f32.mrb[4].mxu1 }
 0x3c1   :  { %v477_v9 = vadd.f32 %v476_v7, %v401_v61  ;;  %v585_v11 = vadd.f32 %v581_v8, %v179_v4  ;;  %v2697_v14 = vpop.f32.mrb[9].mxu0  ;;  %v2708_v15 = vpop.f32.mrb[5].mxu1  ;;  %v184_v4 = vadd.f32 %v3373_v13, %v3453_v58 }
 0x3c3   :  { %v480_v16 = vadd.f32 %v3482_v6, %v477_v9  ;;  %v2488_v17 = vmul.f32 -1.442695, %v585_v11 }
 0x3c5   :  { %v2486_v18 = vmul.f32 -1.442695, %v480_v16  ;;  %3091 = vpow2.f32 %v2488_v17 }
 0x3c7   :  { %3093 = vpow2.f32 %v2486_v18 }
 0x3c8   :  { %3095 = vtanh.f32 %v585_v11 }
 0x3c9   :  { %3097 = vtanh.f32 %v480_v16 }
 0x3cf   :  { %v3092_v19 = vpop.eup %3091 }
 0x3d0   :  { %v589_v12 = vadd.f32 1.0, %v3092_v19 }
 0x3d1   :  { %v3094_v20 = vpop.eup %3093 }
 0x3d2   :  { %v484_v21 = vadd.f32 1.0, %v3094_v20  ;;  %3099 = vrcp.f32 %v589_v12  ;;  %v3096_v22 = vpop.eup %3095 }
 0x3d3   :  { %v3098_v23 = vpop.eup %3097 }
 0x3d4   :  { %3101 = vrcp.f32 %v484_v21 }
 0x3dc   :  { %v3100_v25 = vpop.eup %3099 }
 0x3dd   :  { %v593_v27 = vsel %vm3376_vm6, %v3096_v22, %v3100_v25 }
 0x3de   :  { %v3102_v26 = vpop.eup %3101  ;;  %596 = vrot.lane.b32.xlu0 %v593_v27, %s3266_s28  ;;  %v594_v36 = vmul.f32 %v593_v27, %v3385_v34 }
 0x3df   :  { %v488_v28 = vsel %vm3376_vm6, %v3098_v23, %v3102_v26 }
 0x3e0   :  { %495 = vrot.lane.b32.xlu1 %v488_v28, %s3266_s28 }
 0x3e4   :  { %490 = vrot.lane.b32.xlu1 %v227_v29, %s3267_s29 }
 0x450   :  { %v597_v30 = vpop.permute.xlu0 %596 }
 0x451   :  { %v599_v31 = vmul.f32 %v597_v30, %v593_v27 }
 0x452   :  { %v496_v32 = vpop.permute.xlu1 %495 }
 0x453   :  { %v498_v33 = vmul.f32 %v496_v32, %v488_v28  ;;  %601 = vrot.lane.b32.xlu1 %v599_v31, %s3267_s29 }
 0x455   :  { %500 = vrot.lane.b32.xlu0 %v498_v33, %s3267_s29 }
 0x456   :  { %v491_v35 = vpop.permute.xlu1 %490 }
 0x457   :  { %v493_v37 = vmul.f32 %v491_v35, %v488_v28 }
 0x4c5   :  { %v602_v39 = vpop.permute.xlu1 %601 }
 0x4c6   :  { %v3495_v40 = vadd.f32 %v602_v39, %v594_v36 }
 0x4c7   :  { %v501_v41 = vpop.permute.xlu0 %500 }
 0x4c8   :  { %v3497_v43 = vadd.f32 %v501_v41, %v493_v37  ;;  %3103 = vtanh.f32 %v3495_v40 }
 0x4ca   :  { %3105 = vtanh.f32 %v3497_v43 }
 0x4d2   :  { %v3104_v44 = vpop.eup %3103 }
 0x4d3   :  { %607 = vrot.lane.b32.xlu1 %v3104_v44, %s3266_s28 }
 0x4d4   :  { %v3106_v45 = vpop.eup %3105 }
 0x4d5   :  { %506 = vrot.lane.b32.xlu0 %v3106_v45, %s3266_s28 }
 0x545   :  { %v608_v46 = vpop.permute.xlu1 %607 }
 0x546   :  { %v610_v47 = vmul.f32 %v608_v46, %v593_v27 }
 0x547   :  { %v507_v34 = vpop.permute.xlu0 %506 }
 0x548   :  { %v509_v50 = vmul.f32 %v507_v34, %v488_v28  ;;  %684 = vrot.lane.b32.xlu1 %v610_v47, %s3267_s29  ;;  %v189_v47 = vadd.f32 %v3451_v57, %v3373_v13 }
 0x54a   :  { %511 = vrot.lane.b32.xlu0 %v509_v50, %s3267_s29 }
 0x5ba   :  { %v685_v51 = vpop.permute.xlu1 %684 }
 0x5bb   :  { %2729 = vmatmul.mubr.msk.f32.vlgmr.msra.gmra.mrb[6].mxu1 %vm45_vm0, %v685_v51 }
 0x5bc   :  { %v512_v52 = vpop.permute.xlu0 %511  ;;  %2973 = vmatpush3.bf16.msra.mxu1 %v3402_v42  ;;  %2750 = vmatprep.mubr.msk.f32.mxu1 %vm3264_vm1, %v3265_v1 }
 0x5bd   :  { %514 = vst.msk [vmem:[#allocation9] sm:$0xff] %vm45_vm0, %v512_v52  ;;  %2718 = vmatmul.mubr.msk.f32.vlgmr.msra.gmra.mrb[10].mxu0 %vm45_vm0, %v512_v52  ;;  %2974 = vmatprep.subr.bf16.mxu1 %v3263_v0 }
 0x5be   :  { %2967 = vmatpush3.bf16.msra.mxu0 %v3342_v5  ;;  %2739 = vmatprep.mubr.msk.f32.mxu0 %vm3264_vm1, %v3265_v1 }
 0x5bf   :  { %2968 = vmatprep.subr.bf16.mxu0 %v3263_v0 }
 0x5c0   :  { %2976 = vmatpush3.bf16.msra.mxu1 %v3417_v48 }
 0x5c1   :  { %2983 = vmatprep.subr.bf16.mxu1 %v3263_v0 }
 0x5c2   :  { %2970 = vmatpush3.bf16.msra.mxu0 %v3359_v10 }
 0x5c3   :  { %2977 = vmatprep.subr.bf16.mxu0 %v3263_v0 }
 0x5c5   :  { %2740 = vmatmul.mubr.msk.f32.vlgmr.msra.gmra.mrb[12].mxu0 %vm45_vm0, %v685_v51 }
 0x5c6   :  { %2979 = vmatpush3.bf16.msra.mxu0 %v3394_v38  ;;  %2761 = vmatprep.mubr.msk.f32.mxu0 %vm3264_vm1, %v3265_v1 }
 0x5c7   :  { %2980 = vmatprep.subr.bf16.mxu0 %v3263_v0 }
 0x5ca   :  { %2982 = vmatpush3.bf16.msra.mxu0 %v3419_v49 }
 0x5cb   :  { %2989 = vmatprep.subr.bf16.mxu0 %v3263_v0 }
 0x68e   :  { %v754_v53 = vpop.f32.mrb[6].mxu1 }
 0x68f   :  { %v2730_v54 = vpop.f32.mrb[7].mxu1 }
 0x690   :  { %v679_v55 = vpop.f32.mrb[10].mxu0 }
 0x691   :  { %v755_v56 = vadd.f32 %v754_v53, %v679_v55  ;;  %v2719_v61 = vpop.f32.mrb[11].mxu0 }
 0x693   :  { %v758_v63 = vadd.f32 %v3482_v6, %v755_v56 }
 0x695   :  { %v2491_v3 = vmul.f32 -1.442695, %v758_v63 }
 0x697   :  { %3107 = vpow2.f32 %v2491_v3 }
 0x698   :  { %v856_v7 = vpop.f32.mrb[12].mxu0 }
 0x699   :  { %v860_v8 = vadd.f32 %v856_v7, %v184_v4  ;;  %v2741_v9 = vpop.f32.mrb[13].mxu0 }
 0x69b   :  { %v2493_v11 = vmul.f32 -1.442695, %v860_v8 }
 0x69d   :  { %3109 = vpow2.f32 %v2493_v11 }
 0x69e   :  { %3111 = vtanh.f32 %v758_v63 }
 0x6a1   :  { %v3108_v14 = vpop.eup %3107 }
 0x6a2   :  { %v762_v15 = vadd.f32 1.0, %v3108_v14 }
 0x6a4   :  { %3113 = vrcp.f32 %v762_v15 }
 0x6a5   :  { %3115 = vtanh.f32 %v860_v8 }
 0x6a7   :  { %v3110_v16 = vpop.eup %3109 }
 0x6a8   :  { %v864_v17 = vadd.f32 1.0, %v3110_v16  ;;  %v3112_v18 = vpop.eup %3111 }
 0x6aa   :  { %3117 = vrcp.f32 %v864_v17 }
 0x6ae   :  { %v3114_v19 = vpop.eup %3113 }
 0x6af   :  { %v766_v20 = vsel %vm3376_vm6, %v3112_v18, %v3114_v19  ;;  %v3116_v58 = vpop.eup %3115 }
 0x6b0   :  { %769 = vrot.lane.b32.xlu0 %v766_v20, %s3266_s28  ;;  %v767_v27 = vmul.f32 %v766_v20, %v3497_v43 }
 0x6b4   :  { %v3118_v12 = vpop.eup %3117 }
 0x6b5   :  { %v868_v21 = vsel %vm3376_vm6, %v3116_v58, %v3118_v12 }
 0x6b6   :  { %871 = vrot.lane.b32.xlu1 %v868_v21, %s3266_s28  ;;  %v869_v30 = vmul.f32 %v868_v21, %v3495_v40 }
 0x722   :  { %v770_v22 = vpop.permute.xlu0 %769 }
 0x723   :  { %v772_v23 = vmul.f32 %v770_v22, %v766_v20 }
 0x725   :  { %774 = vrot.lane.b32.xlu0 %v772_v23, %s3267_s29 }
 0x728   :  { %v872_v25 = vpop.permute.xlu1 %871 }
 0x729   :  { %v874_v26 = vmul.f32 %v872_v25, %v868_v21 }
 0x72b   :  { %876 = vrot.lane.b32.xlu1 %v874_v26, %s3267_s29 }
 0x797   :  { %v775_v28 = vpop.permute.xlu0 %774 }
 0x798   :  { %v3539_v29 = vadd.f32 %v775_v28, %v767_v27 }
 0x79a   :  { %3119 = vtanh.f32 %v3539_v29 }
 0x79d   :  { %v877_v31 = vpop.permute.xlu1 %876 }
 0x79e   :  { %v3543_v32 = vadd.f32 %v877_v31, %v869_v30 }
 0x7a0   :  { %3121 = vtanh.f32 %v3543_v32 }
 0x7a4   :  { %v3120_v33 = vpop.eup %3119 }
 0x7a5   :  { %780 = vrot.lane.b32.xlu0 %v3120_v33, %s3266_s28 }
 0x7aa   :  { %v3122_v35 = vpop.eup %3121 }
 0x7ab   :  { %882 = vrot.lane.b32.xlu1 %v3122_v35, %s3266_s28 }
 0x817   :  { %v781_v36 = vpop.permute.xlu0 %780 }
 0x818   :  { %v3548_v37 = vmul.f32 %v781_v36, %v766_v20 }
 0x81a   :  { %886 = vrot.lane.b32.xlu0 %v3548_v37, %s3267_s29 }
 0x81d   :  { %v883_v39 = vpop.permute.xlu1 %882 }
 0x81e   :  { %v885_v41 = vmul.f32 %v883_v39, %v868_v21 }
 0x820   :  { %961 = vrot.lane.b32.xlu1 %v885_v41, %s3267_s29 }
 0x88c   :  { %v887_v40 = vpop.permute.xlu0 %886 }
 0x88d   :  { %2751 = vmatmul.mubr.msk.f32.vlgmr.msra.gmra.mrb[8].mxu1 %vm45_vm0, %v887_v40 }
 0x88e   :  { %2985 = vmatpush3.bf16.msra.mxu1 %v3342_v5  ;;  %2772 = vmatprep.mubr.msk.f32.mxu1 %vm3264_vm1, %v3265_v1 }
 0x88f   :  { %2986 = vmatprep.subr.bf16.mxu1 %v3263_v0 }
 0x892   :  { %v962_v43 = vpop.permute.xlu1 %961  ;;  %2988 = vmatpush3.bf16.msra.mxu1 %v3359_v10 }
 0x893   :  { %2762 = vmatmul.mubr.msk.f32.vlgmr.msra.gmra.mrb[14].mxu0 %vm45_vm0, %v962_v43  ;;  %2995 = vmatprep.subr.bf16.mxu1 %v3263_v0 }
 0x894   :  { %2991 = vmatpush3.bf16.msra.mxu0 %v3402_v42  ;;  %2783 = vmatprep.mubr.msk.f32.mxu0 %vm3264_vm1, %v3265_v1 }
 0x895   :  { %2773 = vmatmul.mubr.msk.f32.vlgmr.msra.gmra.mrb[10].mxu1 %vm45_vm0, %v962_v43  ;;  %2992 = vmatprep.subr.bf16.mxu0 %v3263_v0  ;;  %v194_v43 = vadd.f32 %v3373_v13, %v3457_v60 }
 0x896   :  { %2997 = vmatpush3.bf16.msra.mxu1 %v3394_v38  ;;  %2794 = vmatprep.mubr.msk.f32.mxu1 %vm3264_vm1, %v3265_v1 }
 0x897   :  { %2998 = vmatprep.subr.bf16.mxu1 %v3263_v0 }
 0x898   :  { %2994 = vmatpush3.bf16.msra.mxu0 %v3417_v48 }
 0x899   :  { %3001 = vmatprep.subr.bf16.mxu0 %v3263_v0 }
 0x89a   :  { %3000 = vmatpush3.bf16.msra.mxu1 %v3419_v49 }
 0x89b   :  { %3007 = vmatprep.subr.bf16.mxu1 %v3263_v0 }
 0x960   :  { %v956_v44 = vpop.f32.mrb[8].mxu1 }
 0x961   :  { %v2752_v45 = vpop.f32.mrb[9].mxu1 }
 0x966   :  { %v1031_v46 = vpop.f32.mrb[14].mxu0 }
 0x967   :  { %v1032_v34 = vadd.f32 %v1031_v46, %v956_v44  ;;  %v2763_v50 = vpop.f32.mrb[15].mxu0 }
 0x968   :  { %v1133_v51 = vpop.f32.mrb[10].mxu1 }
 0x969   :  { %v1035_v52 = vadd.f32 %v3482_v6, %v1032_v34  ;;  %v1137_v53 = vadd.f32 %v1133_v51, %v189_v47  ;;  %v2774_v54 = vpop.f32.mrb[11].mxu1 }
 0x96b   :  { %v2496_v55 = vmul.f32 -1.442695, %v1035_v52  ;;  %v2498_v56 = vmul.f32 -1.442695, %v1137_v53 }
 0x96d   :  { %3123 = vpow2.f32 %v2496_v55 }
 0x96e   :  { %3125 = vpow2.f32 %v2498_v56 }
 0x96f   :  { %3127 = vtanh.f32 %v1035_v52 }
 0x970   :  { %3129 = vtanh.f32 %v1137_v53 }
 0x977   :  { %v3124_v61 = vpop.eup %3123 }
 0x978   :  { %v3126_v63 = vpop.eup %3125  ;;  %v1039_v3 = vadd.f32 1.0, %v3124_v61 }
 0x979   :  { %v1141_v4 = vadd.f32 1.0, %v3126_v63  ;;  %v3128_v57 = vpop.eup %3127 }
 0x97a   :  { %3131 = vrcp.f32 %v1039_v3  ;;  %v3130_v7 = vpop.eup %3129 }
 0x97b   :  { %3133 = vrcp.f32 %v1141_v4 }
 0x984   :  { %v3132_v8 = vpop.eup %3131 }
 0x985   :  { %v3134_v9 = vpop.eup %3133  ;;  %v1043_v11 = vsel %vm3376_vm6, %v3128_v57, %v3132_v8 }
 0x986   :  { %1046 = vrot.lane.b32.xlu0 %v1043_v11, %s3266_s28  ;;  %v1145_v14 = vsel %vm3376_vm6, %v3130_v7, %v3134_v9  ;;  %v1044_v19 = vmul.f32 %v1043_v11, %v3539_v29 }
 0x987   :  { %1148 = vrot.lane.b32.xlu1 %v1145_v14, %s3266_s28  ;;  %v1146_v58 = vmul.f32 %v1145_v14, %v3543_v32 }
 0x9f8   :  { %v1047_v15 = vpop.permute.xlu0 %1046 }
 0x9f9   :  { %v1049_v16 = vmul.f32 %v1047_v15, %v1043_v11  ;;  %v1149_v17 = vpop.permute.xlu1 %1148 }
 0x9fa   :  { %v1151_v18 = vmul.f32 %v1149_v17, %v1145_v14 }
 0x9fb   :  { %1051 = vrot.lane.b32.xlu0 %v1049_v16, %s3267_s29 }
 0x9fc   :  { %1153 = vrot.lane.b32.xlu1 %v1151_v18, %s3267_s29 }
 0xa6d   :  { %v1052_v20 = vpop.permute.xlu0 %1051 }
 0xa6e   :  { %v3587_v12 = vadd.f32 %v1052_v20, %v1044_v19  ;;  %v1154_v21 = vpop.permute.xlu1 %1153 }
 0xa6f   :  { %v3589_v22 = vadd.f32 %v1154_v21, %v1146_v58 }
 0xa70   :  { %3135 = vtanh.f32 %v3587_v12 }
 0xa71   :  { %3137 = vtanh.f32 %v3589_v22 }
 0xa7a   :  { %v3136_v23 = vpop.eup %3135 }
 0xa7b   :  { %v3138_v25 = vpop.eup %3137  ;;  %1057 = vrot.lane.b32.xlu0 %v3136_v23, %s3266_s28 }
 0xa7c   :  { %1159 = vrot.lane.b32.xlu1 %v3138_v25, %s3266_s28 }
 0xaed   :  { %v1058_v26 = vpop.permute.xlu0 %1057 }
 0xaee   :  { %v3595_v27 = vmul.f32 %v1058_v26, %v1043_v11  ;;  %v1160_v28 = vpop.permute.xlu1 %1159 }
 0xaef   :  { %v1162_v29 = vmul.f32 %v1160_v28, %v1145_v14 }
 0xaf0   :  { %1163 = vrot.lane.b32.xlu0 %v3595_v27, %s3267_s29 }
 0xaf1   :  { %1238 = vrot.lane.b32.xlu1 %v1162_v29, %s3267_s29  ;;  %v199_v29 = vadd.f32 %v3455_v59, %v3373_v13 }
 0xb62   :  { %v1164_v30 = vpop.permute.xlu0 %1163 }
 0xb63   :  { %v1239_v31 = vpop.permute.xlu1 %1238  ;;  %2784 = vmatmul.mubr.msk.f32.vlgmr.msra.gmra.mrb[16].mxu0 %vm45_vm0, %v1164_v30 }
 0xb64   :  { %2795 = vmatmul.mubr.msk.f32.vlgmr.msra.gmra.mrb[12].mxu1 %vm45_vm0, %v1239_v31  ;;  %3003 = vmatpush3.bf16.msra.mxu0 %v3342_v5 }
 0xb65   :  { %3004 = vmatprep.subr.bf16.mxu0 %v3263_v0  ;;  %2805 = vmatprep.mubr.msk.f32.mxu0 %vm3264_vm1, %v3265_v1 }
 0xb66   :  { %3009 = vmatpush3.bf16.msra.mxu1 %v3402_v42  ;;  %2816 = vmatprep.mubr.msk.f32.mxu1 %vm3264_vm1, %v3265_v1 }
 0xb67   :  { %3010 = vmatprep.subr.bf16.mxu1 %v3263_v0 }
 0xb68   :  { %3006 = vmatpush3.bf16.msra.mxu0 %v3359_v10 }
 0xb69   :  { %3013 = vmatprep.subr.bf16.mxu0 %v3263_v0 }
 0xb6a   :  { %3012 = vmatpush3.bf16.msra.mxu1 %v3417_v48 }
 0xb6b   :  { %2806 = vmatmul.mubr.msk.f32.vlgmr.msra.gmra.mrb[18].mxu0 %vm45_vm0, %v1239_v31  ;;  %3019 = vmatprep.subr.bf16.mxu1 %v3263_v0 }
 0xb6c   :  { %3015 = vmatpush3.bf16.msra.mxu0 %v3394_v38  ;;  %2827 = vmatprep.mubr.msk.f32.mxu0 %vm3264_vm1, %v3265_v1 }
 0xb6d   :  { %3016 = vmatprep.subr.bf16.mxu0 %v3263_v0 }
 0xb70   :  { %3018 = vmatpush3.bf16.msra.mxu0 %v3419_v49 }
 0xb71   :  { %3025 = vmatprep.subr.bf16.mxu0 %v3263_v0 }
 0xc36   :  { %v1233_v32 = vpop.f32.mrb[16].mxu0 }
 0xc37   :  { %v1308_v33 = vpop.f32.mrb[12].mxu1  ;;  %v2785_v35 = vpop.f32.mrb[17].mxu0 }
 0xc38   :  { %v1309_v36 = vadd.f32 %v1308_v33, %v1233_v32  ;;  %v2796_v39 = vpop.f32.mrb[13].mxu1 }
 0xc3a   :  { %v1312_v41 = vadd.f32 %v3482_v6, %v1309_v36 }
 0xc3c   :  { %v2501_v40 = vmul.f32 -1.442695, %v1312_v41 }
 0xc3e   :  { %3139 = vpow2.f32 %v2501_v40  ;;  %v1406_v44 = vpop.f32.mrb[18].mxu0 }
 0xc3f   :  { %v1410_v45 = vadd.f32 %v1406_v44, %v194_v43  ;;  %v2807_v46 = vpop.f32.mrb[19].mxu0 }
 0xc41   :  { %v2503_v47 = vmul.f32 -1.442695, %v1410_v45 }
 0xc43   :  { %3141 = vpow2.f32 %v2503_v47 }
 0xc44   :  { %3143 = vtanh.f32 %v1312_v41 }
 0xc48   :  { %v3140_v34 = vpop.eup %3139 }
 0xc49   :  { %v1316_v50 = vadd.f32 1.0, %v3140_v34 }
 0xc4b   :  { %3145 = vrcp.f32 %v1316_v50 }
 0xc4c   :  { %3147 = vtanh.f32 %v1410_v45 }
 0xc4d   :  { %v3142_v51 = vpop.eup %3141 }
 0xc4e   :  { %v1414_v52 = vadd.f32 1.0, %v3142_v51  ;;  %v3144_v53 = vpop.eup %3143 }
 0xc50   :  { %3149 = vrcp.f32 %v1414_v52 }
 0xc55   :  { %v3146_v54 = vpop.eup %3145 }
 0xc56   :  { %v1320_v55 = vsel %vm3376_vm6, %v3144_v53, %v3146_v54  ;;  %v3148_v60 = vpop.eup %3147 }
 0xc57   :  { %1323 = vrot.lane.b32.xlu0 %v1320_v55, %s3266_s28  ;;  %v1321_v7 = vmul.f32 %v1320_v55, %v3587_v12 }
 0xc5a   :  { %v3150_v56 = vpop.eup %3149 }
 0xc5b   :  { %v1418_v61 = vsel %vm3376_vm6, %v3148_v60, %v3150_v56 }
 0xc5c   :  { %1421 = vrot.lane.b32.xlu1 %v1418_v61, %s3266_s28  ;;  %v1419_v11 = vmul.f32 %v1418_v61, %v3589_v22 }
 0xcc9   :  { %v1324_v63 = vpop.permute.xlu0 %1323 }
 0xcca   :  { %v1326_v3 = vmul.f32 %v1324_v63, %v1320_v55 }
 0xccc   :  { %1328 = vrot.lane.b32.xlu0 %v1326_v3, %s3267_s29 }
 0xcce   :  { %v1422_v4 = vpop.permute.xlu1 %1421 }
 0xccf   :  { %v1424_v57 = vmul.f32 %v1422_v4, %v1418_v61 }
 0xcd1   :  { %1426 = vrot.lane.b32.xlu1 %v1424_v57, %s3267_s29 }
 0xd3e   :  { %v1329_v8 = vpop.permute.xlu0 %1328 }
 0xd3f   :  { %v3633_v9 = vadd.f32 %v1329_v8, %v1321_v7 }
 0xd41   :  { %3151 = vtanh.f32 %v3633_v9 }
 0xd43   :  { %v1427_v14 = vpop.permute.xlu1 %1426 }
 0xd44   :  { %v3637_v15 = vadd.f32 %v1427_v14, %v1419_v11 }
 0xd46   :  { %3153 = vtanh.f32 %v3637_v15 }
 0xd4b   :  { %v3152_v16 = vpop.eup %3151 }
 0xd4c   :  { %1334 = vrot.lane.b32.xlu0 %v3152_v16, %s3266_s28 }
 0xd50   :  { %v3154_v17 = vpop.eup %3153 }
 0xd51   :  { %1432 = vrot.lane.b32.xlu1 %v3154_v17, %s3266_s28 }
 0xdbe   :  { %v1335_v18 = vpop.permute.xlu0 %1334 }
 0xdbf   :  { %v3642_v19 = vmul.f32 %v1335_v18, %v1320_v55 }
 0xdc1   :  { %1437 = vrot.lane.b32.xlu0 %v3642_v19, %s3267_s29 }
 0xdc3   :  { %v1433_v20 = vpop.permute.xlu1 %1432 }
 0xdc4   :  { %v1435_v58 = vmul.f32 %v1433_v20, %v1418_v61 }
 0xdc6   :  { %1512 = vrot.lane.b32.xlu1 %v1435_v58, %s3267_s29 }
 0xe33   :  { %v1438_v12 = vpop.permute.xlu0 %1437 }
 0xe34   :  { %2817 = vmatmul.mubr.msk.f32.vlgmr.msra.gmra.mrb[14].mxu1 %vm45_vm0, %v1438_v12 }
 0xe35   :  { %3021 = vmatpush3.bf16.msra.mxu1 %v3342_v5  ;;  %2838 = vmatprep.mubr.msk.f32.mxu1 %vm3264_vm1, %v3265_v1 }
 0xe36   :  { %3022 = vmatprep.subr.bf16.mxu1 %v3263_v0 }
 0xe38   :  { %v1513_v21 = vpop.permute.xlu1 %1512 }
 0xe39   :  { %3024 = vmatpush3.bf16.msra.mxu1 %v3359_v10  ;;  %2828 = vmatmul.mubr.msk.f32.vlgmr.msra.gmra.mrb[20].mxu0 %vm45_vm0, %v1513_v21 }
 0xe3a   :  { %3027 = vmatpush3.bf16.msra.mxu0 %v3402_v42  ;;  %3031 = vmatprep.subr.bf16.mxu1 %v3263_v0 }
 0xe3b   :  { %3028 = vmatprep.subr.bf16.mxu0 %v3263_v0  ;;  %2849 = vmatprep.mubr.msk.f32.mxu0 %vm3264_vm1, %v3265_v1 }
 0xe3c   :  { %2839 = vmatmul.mubr.msk.f32.vlgmr.msra.gmra.mrb[16].mxu1 %vm45_vm0, %v1513_v21  ;;  %v204_v21 = vadd.f32 %v3373_v13, %v3461_v2 }
 0xe3d   :  { %3033 = vmatpush3.bf16.msra.mxu1 %v3394_v38  ;;  %2860 = vmatprep.mubr.msk.f32.mxu1 %vm3264_vm1, %v3265_v1 }
 0xe3e   :  { %3030 = vmatpush3.bf16.msra.mxu0 %v3417_v48  ;;  %3034 = vmatprep.subr.bf16.mxu1 %v3263_v0 }
 0xe3f   :  { %3037 = vmatprep.subr.bf16.mxu0 %v3263_v0 }
 0xe41   :  { %3036 = vmatpush3.bf16.msra.mxu1 %v3419_v49 }
 0xe42   :  { %3043 = vmatprep.subr.bf16.mxu1 %v3263_v0 }
 0xf07   :  { %v1507_v22 = vpop.f32.mrb[14].mxu1 }
 0xf08   :  { %v2818_v23 = vpop.f32.mrb[15].mxu1 }
 0xf0c   :  { %v1582_v25 = vpop.f32.mrb[20].mxu0 }
 0xf0d   :  { %v1583_v26 = vadd.f32 %v1582_v25, %v1507_v22  ;;  %v2829_v28 = vpop.f32.mrb[21].mxu0 }
 0xf0f   :  { %v1586_v30 = vadd.f32 %v3482_v6, %v1583_v26  ;;  %v1683_v31 = vpop.f32.mrb[16].mxu1 }
 0xf10   :  { %v1687_v32 = vadd.f32 %v1683_v31, %v199_v29  ;;  %v2840_v33 = vpop.f32.mrb[17].mxu1 }
 0xf11   :  { %v2506_v35 = vmul.f32 -1.442695, %v1586_v30 }
 0xf12   :  { %v2508_v36 = vmul.f32 -1.442695, %v1687_v32 }
 0xf13   :  { %3155 = vpow2.f32 %v2506_v35 }
 0xf14   :  { %3157 = vpow2.f32 %v2508_v36 }
 0xf15   :  { %3159 = vtanh.f32 %v1586_v30 }
 0xf16   :  { %3161 = vtanh.f32 %v1687_v32 }
 0xf1d   :  { %v3156_v39 = vpop.eup %3155 }
 0xf1e   :  { %v3158_v41 = vpop.eup %3157  ;;  %v1590_v40 = vadd.f32 1.0, %v3156_v39 }
 0xf1f   :  { %v1691_v43 = vadd.f32 1.0, %v3158_v41  ;;  %v3160_v44 = vpop.eup %3159 }
 0xf20   :  { %3163 = vrcp.f32 %v1590_v40  ;;  %v3162_v45 = vpop.eup %3161 }
 0xf21   :  { %3165 = vrcp.f32 %v1691_v43 }
 0xf2a   :  { %v3164_v59 = vpop.eup %3163 }
 0xf2b   :  { %v3166_v46 = vpop.eup %3165  ;;  %v1594_v47 = vsel %vm3376_vm6, %v3160_v44, %v3164_v59 }
 0xf2c   :  { %1597 = vrot.lane.b32.xlu0 %v1594_v47, %s3266_s28  ;;  %v1695_v34 = vsel %vm3376_vm6, %v3162_v45, %v3166_v46  ;;  %v1595_v54 = vmul.f32 %v1594_v47, %v3633_v9 }
 0xf2d   :  { %1698 = vrot.lane.b32.xlu1 %v1695_v34, %s3266_s28  ;;  %v1696_v60 = vmul.f32 %v1695_v34, %v3637_v15 }
 0xf9e   :  { %v1598_v50 = vpop.permute.xlu0 %1597 }
 0xf9f   :  { %v1600_v51 = vmul.f32 %v1598_v50, %v1594_v47  ;;  %v1699_v52 = vpop.permute.xlu1 %1698 }
 0xfa0   :  { %v1701_v53 = vmul.f32 %v1699_v52, %v1695_v34 }
 0xfa1   :  { %1602 = vrot.lane.b32.xlu0 %v1600_v51, %s3267_s29 }
 0xfa2   :  { %1703 = vrot.lane.b32.xlu1 %v1701_v53, %s3267_s29 }
0x1013   :  { %v1603_v55 = vpop.permute.xlu0 %1602 }
0x1014   :  { %v3681_v56 = vadd.f32 %v1603_v55, %v1595_v54  ;;  %v1704_v61 = vpop.permute.xlu1 %1703 }
0x1015   :  { %v3683_v63 = vadd.f32 %v1704_v61, %v1696_v60 }
0x1016   :  { %3167 = vtanh.f32 %v3681_v56 }
0x1017   :  { %3169 = vtanh.f32 %v3683_v63 }
0x1020   :  { %v3168_v3 = vpop.eup %3167 }
0x1021   :  { %v3170_v4 = vpop.eup %3169  ;;  %1608 = vrot.lane.b32.xlu0 %v3168_v3, %s3266_s28  ;;  %v3211_v3 = vld [vmem:[%s3817_s3] ss:$0 sm:$0xff]  ;;  %s3268_s3 = smov 96  }
0x1022   :  { %1709 = vrot.lane.b32.xlu1 %v3170_v4, %s3266_s28 }
0x1093   :  { %v1609_v57 = vpop.permute.xlu0 %1608 }
0x1094   :  { %v1611_v7 = vmul.f32 %v1609_v57, %v1594_v47  ;;  %v1710_v8 = vpop.permute.xlu1 %1709 }
0x1095   :  { %v1712_v9 = vmul.f32 %v1710_v8, %v1695_v34 }
0x1096   :  { %1613 = vrot.lane.b32.xlu0 %v1611_v7, %s3267_s29 }
0x1097   :  { %1786 = vrot.lane.b32.xlu1 %v1712_v9, %s3267_s29 }
0x1108   :  { %v1614_v11 = vpop.permute.xlu0 %1613 }
0x1109   :  { %1616 = vst.msk [vmem:[#allocation9 + $0x8] sm:$0xff] %vm45_vm0, %v1614_v11  ;;  %v1787_v14 = vpop.permute.xlu1 %1786  ;;  %2850 = vmatmul.mubr.msk.f32.vlgmr.msra.gmra.mrb[22].mxu0 %vm45_vm0, %v1614_v11 }
0x110a   :  { %2861 = vmatmul.mubr.msk.f32.vlgmr.msra.gmra.mrb[18].mxu1 %vm45_vm0, %v1787_v14  ;;  %3039 = vmatpush3.bf16.msra.mxu0 %v3342_v5 }
0x110b   :  { %3040 = vmatprep.subr.bf16.mxu0 %v3263_v0  ;;  %2871 = vmatprep.mubr.msk.f32.mxu0 %vm3264_vm1, %v3265_v1 }
0x110c   :  { %3045 = vmatpush3.bf16.msra.mxu1 %v3402_v42  ;;  %2882 = vmatprep.mubr.msk.f32.mxu1 %vm3264_vm1, %v3265_v1 }
0x110d   :  { %3046 = vmatprep.subr.bf16.mxu1 %v3263_v0 }
0x110e   :  { %3042 = vmatpush3.bf16.msra.mxu0 %v3359_v10 }
0x110f   :  { %3049 = vmatprep.subr.bf16.mxu0 %v3263_v0 }
0x1110   :  { %3048 = vmatpush3.bf16.msra.mxu1 %v3417_v48 }
0x1111   :  { %2872 = vmatmul.mubr.msk.f32.vlgmr.msra.gmra.mrb[24].mxu0 %vm45_vm0, %v1787_v14  ;;  %3055 = vmatprep.subr.bf16.mxu1 %v3263_v0 }
0x1112   :  { %3051 = vmatpush3.bf16.msra.mxu0 %v3394_v38  ;;  %2893 = vmatprep.mubr.msk.f32.mxu0 %vm3264_vm1, %v3265_v1 }
0x1113   :  { %3052 = vmatprep.subr.bf16.mxu0 %v3263_v0 }
0x1116   :  { %3054 = vmatpush3.bf16.msra.mxu0 %v3419_v49 }
0x1117   :  { %3061 = vmatprep.subr.bf16.mxu0 %v3263_v0 }
0x11dc   :  { %v1781_v15 = vpop.f32.mrb[22].mxu0 }
0x11dd   :  { %v1856_v16 = vpop.f32.mrb[18].mxu1  ;;  %v2851_v17 = vpop.f32.mrb[23].mxu0 }
0x11de   :  { %v1857_v18 = vadd.f32 %v1856_v16, %v1781_v15  ;;  %v2862_v20 = vpop.f32.mrb[19].mxu1 }
0x11e0   :  { %v1860_v58 = vadd.f32 %v3482_v6, %v1857_v18 }
0x11e2   :  { %v2511_v12 = vmul.f32 -1.442695, %v1860_v58 }
0x11e4   :  { %3171 = vpow2.f32 %v2511_v12  ;;  %v1957_v22 = vpop.f32.mrb[24].mxu0 }
0x11e5   :  { %v1961_v23 = vadd.f32 %v1957_v22, %v204_v21  ;;  %v2873_v25 = vpop.f32.mrb[25].mxu0 }
0x11e7   :  { %v2513_v26 = vmul.f32 -1.442695, %v1961_v23 }
0x11e9   :  { %3173 = vpow2.f32 %v2513_v26 }
0x11ea   :  { %3175 = vtanh.f32 %v1860_v58 }
0x11ee   :  { %v3172_v28 = vpop.eup %3171 }
0x11ef   :  { %v1864_v29 = vadd.f32 1.0, %v3172_v28 }
0x11f1   :  { %3177 = vrcp.f32 %v1864_v29 }
0x11f2   :  { %3179 = vtanh.f32 %v1961_v23 }
0x11f3   :  { %v3174_v30 = vpop.eup %3173 }
0x11f4   :  { %v1965_v31 = vadd.f32 1.0, %v3174_v30  ;;  %v3176_v32 = vpop.eup %3175 }
0x11f6   :  { %3181 = vrcp.f32 %v1965_v31 }
0x11fb   :  { %v3178_v33 = vpop.eup %3177 }
0x11fc   :  { %v1868_v35 = vsel %vm3376_vm6, %v3176_v32, %v3178_v33  ;;  %v3180_v13 = vpop.eup %3179 }
0x11fd   :  { %1871 = vrot.lane.b32.xlu0 %v1868_v35, %s3266_s28  ;;  %v1869_v44 = vmul.f32 %v1868_v35, %v3681_v56 }
0x1200   :  { %v3182_v2 = vpop.eup %3181 }
0x1201   :  { %v1969_v36 = vsel %vm3376_vm6, %v3180_v13, %v3182_v2 }
0x1202   :  { %1972 = vrot.lane.b32.xlu1 %v1969_v36, %s3266_s28  ;;  %v1970_v46 = vmul.f32 %v1969_v36, %v3683_v63 }
0x126f   :  { %v1872_v39 = vpop.permute.xlu0 %1871 }
0x1270   :  { %v1874_v41 = vmul.f32 %v1872_v39, %v1868_v35 }
0x1272   :  { %1876 = vrot.lane.b32.xlu0 %v1874_v41, %s3267_s29 }
0x1274   :  { %v1973_v40 = vpop.permute.xlu1 %1972 }
0x1275   :  { %v1975_v43 = vmul.f32 %v1973_v40, %v1969_v36 }
0x1277   :  { %1977 = vrot.lane.b32.xlu1 %v1975_v43, %s3267_s29 }
0x12e4   :  { %v1877_v45 = vpop.permute.xlu0 %1876 }
0x12e5   :  { %v3725_v59 = vadd.f32 %v1877_v45, %v1869_v44 }
0x12e7   :  { %3183 = vtanh.f32 %v3725_v59 }
0x12e9   :  { %v1978_v47 = vpop.permute.xlu1 %1977 }
0x12ea   :  { %v3729_v34 = vadd.f32 %v1978_v47, %v1970_v46 }
0x12ec   :  { %3185 = vtanh.f32 %v3729_v34 }
0x12f1   :  { %v3184_v50 = vpop.eup %3183 }
0x12f2   :  { %1882 = vrot.lane.b32.xlu0 %v3184_v50, %s3266_s28 }
0x12f6   :  { %v3186_v51 = vpop.eup %3185 }
0x12f7   :  { %1983 = vrot.lane.b32.xlu1 %v3186_v51, %s3266_s28 }
0x1364   :  { %v1883_v52 = vpop.permute.xlu0 %1882 }
0x1365   :  { %v3734_v53 = vmul.f32 %v1883_v52, %v1868_v35 }
0x1367   :  { %1987 = vrot.lane.b32.xlu0 %v3734_v53, %s3267_s29 }
0x1369   :  { %v1984_v54 = vpop.permute.xlu1 %1983 }
0x136a   :  { %v1986_v55 = vmul.f32 %v1984_v54, %v1969_v36 }
0x136c   :  { %2062 = vrot.lane.b32.xlu1 %v1986_v55, %s3267_s29 }
0x13d9   :  { %v1988_v60 = vpop.permute.xlu0 %1987 }
0x13da   :  { %2883 = vmatmul.mubr.msk.f32.vlgmr.msra.gmra.mrb[20].mxu1 %vm45_vm0, %v1988_v60 }
0x13db   :  { %3057 = vmatpush3.bf16.msra.mxu1 %v3342_v5  ;;  %2904 = vmatprep.mubr.msk.f32.mxu1 %vm3264_vm1, %v3265_v1 }
0x13dc   :  { %3058 = vmatprep.subr.bf16.mxu1 %v3263_v0 }
0x13de   :  { %v2063_v56 = vpop.permute.xlu1 %2062 }
0x13df   :  { %3060 = vmatpush3.bf16.msra.mxu1 %v3359_v10  ;;  %2894 = vmatmul.mubr.msk.f32.vlgmr.msra.gmra.mrb[26].mxu0 %vm45_vm0, %v2063_v56 }
0x13e0   :  { %3067 = vmatprep.subr.bf16.mxu1 %v3263_v0  ;;  %3063 = vmatpush3.bf16.msra.mxu0 %v3402_v42 }
0x13e1   :  { %3064 = vmatprep.subr.bf16.mxu0 %v3263_v0  ;;  %2915 = vmatprep.mubr.msk.f32.mxu0 %vm3264_vm1, %v3265_v1 }
0x13e2   :  { %2905 = vmatmul.mubr.msk.f32.vlgmr.msra.gmra.mrb[22].mxu1 %vm45_vm0, %v2063_v56 }
0x13e3   :  { %3069 = vmatpush3.bf16.msra.mxu1 %v3394_v38  ;;  %2926 = vmatprep.mubr.msk.f32.mxu1 %vm3264_vm1, %v3265_v1  ;;  %v209_v38 = vadd.f32 %v3211_v3, %v3459_v62 }
0x13e4   :  { %3070 = vmatprep.subr.bf16.mxu1 %v3263_v0  ;;  %3066 = vmatpush3.bf16.msra.mxu0 %v3417_v48 }
0x13e7   :  { %3072 = vmatpush3.bf16.msra.mxu1 %v3419_v49 }
0x14ad   :  { %v2057_v5 = vpop.f32.mrb[20].mxu1 }
0x14ae   :  { %v2884_v10 = vpop.f32.mrb[21].mxu1 }
0x14b2   :  { %v2132_v42 = vpop.f32.mrb[26].mxu0 }
0x14b3   :  { %v2133_v61 = vadd.f32 %v2132_v42, %v2057_v5  ;;  %v2895_v63 = vpop.f32.mrb[27].mxu0 }
0x14b5   :  { %v2136_v4 = vadd.f32 %v3482_v6, %v2133_v61  ;;  %v2233_v1 = vpop.f32.mrb[22].mxu1 }
0x14b6   :  { %v2237_v57 = vadd.f32 %v2233_v1, %v209_v38  ;;  %v2906_v0 = vpop.f32.mrb[23].mxu1 }
0x14b7   :  { %v2516_v7 = vmul.f32 -1.442695, %v2136_v4 }
0x14b8   :  { %v2518_v48 = vmul.f32 -1.442695, %v2237_v57 }
0x14b9   :  { %3187 = vpow2.f32 %v2516_v7 }
0x14ba   :  { %3189 = vpow2.f32 %v2518_v48 }
0x14bb   :  { %3191 = vtanh.f32 %v2136_v4 }
0x14bc   :  { %3193 = vtanh.f32 %v2237_v57 }
0x14c3   :  { %v3188_v49 = vpop.eup %3187 }
0x14c4   :  { %v3190_v8 = vpop.eup %3189  ;;  %v2140_v9 = vadd.f32 1.0, %v3188_v49 }
0x14c5   :  { %v2241_v11 = vadd.f32 1.0, %v3190_v8  ;;  %v3192_v14 = vpop.eup %3191 }
0x14c6   :  { %3195 = vrcp.f32 %v2140_v9  ;;  %v3194_v15 = vpop.eup %3193 }
0x14c7   :  { %3197 = vrcp.f32 %v2241_v11 }
0x14d0   :  { %v3196_v62 = vpop.eup %3195 }
0x14d1   :  { %v3198_v16 = vpop.eup %3197  ;;  %v2144_v17 = vsel %vm3376_vm6, %v3192_v14, %v3196_v62 }
0x14d2   :  { %2147 = vrot.lane.b32.xlu0 %v2144_v17, %s3266_s28  ;;  %v2245_v18 = vsel %vm3376_vm6, %v3194_v15, %v3198_v16  ;;  %v2145_v22 = vmul.f32 %v2144_v17, %v3725_v59 }
0x14d3   :  { %2248 = vrot.lane.b32.xlu1 %v2245_v18, %s3266_s28  ;;  %v2246_v25 = vmul.f32 %v2245_v18, %v3729_v34 }
0x1544   :  { %v2148_v20 = vpop.permute.xlu0 %2147 }
0x1545   :  { %v2150_v58 = vmul.f32 %v2148_v20, %v2144_v17  ;;  %v2249_v12 = vpop.permute.xlu1 %2248 }
0x1546   :  { %v2251_v21 = vmul.f32 %v2249_v12, %v2245_v18 }
0x1547   :  { %2152 = vrot.lane.b32.xlu0 %v2150_v58, %s3267_s29 }
0x1548   :  { %2253 = vrot.lane.b32.xlu1 %v2251_v21, %s3267_s29 }
0x15b9   :  { %v2153_v23 = vpop.permute.xlu0 %2152 }
0x15ba   :  { %v2155_v26 = vadd.f32 %v2153_v23, %v2145_v22  ;;  %v2254_v28 = vpop.permute.xlu1 %2253 }
0x15bb   :  { %v2256_v29 = vadd.f32 %v2254_v28, %v2246_v25 }
0x15bc   :  { %3199 = vtanh.f32 %v2155_v26 }
0x15bd   :  { %3201 = vtanh.f32 %v2256_v29 }
0x15c6   :  { %v3200_v30 = vpop.eup %3199 }
0x15c7   :  { %v3202_v31 = vpop.eup %3201  ;;  %2158 = vrot.lane.b32.xlu0 %v3200_v30, %s3266_s28 }
0x15c8   :  { %2259 = vrot.lane.b32.xlu1 %v3202_v31, %s3266_s28 }
0x1639   :  { %v2159_v32 = vpop.permute.xlu0 %2158 }
0x163a   :  { %v2161_v33 = vmul.f32 %v2159_v32, %v2144_v17  ;;  %v2260_v35 = vpop.permute.xlu1 %2259 }
0x163b   :  { %v2262_v13 = vmul.f32 %v2260_v35, %v2245_v18 }
0x163c   :  { %2263 = vrot.lane.b32.xlu0 %v2161_v33, %s3267_s29 }
0x163d   :  { %2338 = vrot.lane.b32.xlu1 %v2262_v13, %s3267_s29 }
0x16ae   :  { %v2264_v2 = vpop.permute.xlu0 %2263 }
0x16af   :  { %v2339_v36 = vpop.permute.xlu1 %2338  ;;  %2916 = vmatmul.mubr.msk.f32.vlgmr.msra.gmra.mrb[28].mxu0 %vm45_vm0, %v2264_v2 }
0x16b0   :  { %2440 = vst.msk [vmem:[#allocation2] sm:$0xff] %vm45_vm0, %v2339_v36  ;;  %2927 = vmatmul.mubr.msk.f32.vlgmr.msra.gmra.mrb[24].mxu1 %vm45_vm0, %v2339_v36 }
0x1782   :  { %v2333_v39 = vpop.f32.mrb[28].mxu0 }
0x1783   :  { %v2408_v41 = vpop.f32.mrb[24].mxu1  ;;  %v2917_v40 = vpop.f32.mrb[29].mxu0 }
0x1784   :  { %v2409_v43 = vadd.f32 %v2408_v41, %v2333_v39  ;;  %v2928_v44 = vpop.f32.mrb[25].mxu1 }
0x1786   :  { %v2412_v45 = vadd.f32 %v3482_v6, %v2409_v43 }
0x1788   :  { %v2521_v59 = vmul.f32 -1.442695, %v2412_v45 }
0x178a   :  { %3203 = vpow2.f32 %v2521_v59 }
0x178b   :  { %3205 = vtanh.f32 %v2412_v45 }
0x1794   :  { %v3204_v46 = vpop.eup %3203 }
0x1795   :  { %v2416_v47 = vadd.f32 1.0, %v3204_v46  ;;  %v3206_v34 = vpop.eup %3205 }
0x1797   :  { %3207 = vrcp.f32 %v2416_v47 }
0x17a1   :  { %v3208_v50 = vpop.eup %3207 }
0x17a2   :  { %v2420_v51 = vsel %vm3376_vm6, %v3206_v34, %v3208_v50 }
0x17a3   :  { %2423 = vrot.lane.b32.xlu0 %v2420_v51, %s3266_s28  ;;  %v2421_v6 = vmul.f32 %v2420_v51, %v2155_v26 }
0x1815   :  { %v2424_v52 = vpop.permute.xlu0 %2423 }
0x1816   :  { %v2426_v54 = vmul.f32 %v2424_v52, %v2420_v51 }
0x1818   :  { %2428 = vrot.lane.b32.xlu1 %v2426_v54, %s3267_s29 }
0x181c   :  { %785 = vrot.lane.b32.xlu1 %v3548_v37, %s3266_s28 }
0x1820   :  { %1062 = vrot.lane.b32.xlu1 %v3595_v27, %s3268_s3 }
0x1824   :  { %2442 = vrot.lane.b32.xlu1 %v2256_v29, %s3268_s3 }
0x188a   :  { %v2429_v55 = vpop.permute.xlu1 %2428 }
0x188b   :  { %v2431_v60 = vadd.f32 %v2429_v55, %v2421_v6 }
0x188d   :  { %3209 = vtanh.f32 %v2431_v60  ;;  %2452 = vrot.lane.b32.xlu1 %v2431_v60, %s3268_s3 }
0x188e   :  { %v786_v24 = vpop.permute.xlu1 %785 }
0x188f   :  { %789 = vst.msk [vmem:[#allocation9] sm:$0xff] %vm788_vm7, %v786_v24 }
0x1892   :  { %v1063_v56 = vpop.permute.xlu1 %1062 }
0x1893   :  { %1066 = vst.msk [vmem:[#allocation9] sm:$0xff] %vm1065_vm8, %v1063_v56 }
0x1894   :  { %1339 = vst.msk [vmem:[#allocation9] sm:$0xff] %vm1338_vm9, %v3642_v19 }
0x1896   :  { %v2443_v37 = vpop.permute.xlu1 %2442 }
0x1897   :  { %v3210_v27 = vpop.eup %3209  ;;  %2445 = vst.msk [vmem:[#allocation3] sm:$0xff] %vm45_vm0, %v2443_v37 }
0x1898   :  { %2434 = vrot.lane.b32.xlu0 %v3210_v27, %s3266_s28 }
0x189c   :  { %1887 = vrot.lane.b32.xlu0 %v3734_v53, %s3266_s28 }
0x18a0   :  { %2163 = vrot.lane.b32.xlu0 %v2161_v33, %s3268_s3 }
0x18ff   :  { %v2453_v5 = vpop.permute.xlu1 %2452 }
0x1900   :  { %2455 = vst.msk [vmem:[#allocation5] sm:$0xff] %vm45_vm0, %v2453_v5 }
0x190a   :  { %v2435_v10 = vpop.permute.xlu0 %2434 }
0x190b   :  { %v2437_v42 = vmul.f32 %v2435_v10, %v2420_v51 }
0x190d   :  { %2447 = vrot.lane.b32.xlu0 %v2437_v42, %s3267_s29 }
0x190e   :  { %v1888_v61 = vpop.permute.xlu0 %1887 }
0x190f   :  { %1890 = vst.msk [vmem:[#allocation9 + $0x8] sm:$0xff] %vm788_vm7, %v1888_v61 }
0x1912   :  { %v2164_v19 = vpop.permute.xlu0 %2163 }
0x1913   :  { %2166 = vst.msk [vmem:[#allocation9 + $0x8] sm:$0xff] %vm1065_vm8, %v2164_v19 }
0x1914   :  { %2438 = vst.msk [vmem:[#allocation9 + $0x8] sm:$0xff] %vm1338_vm9, %v2437_v42 }
0x1915   :  { %3245 = shalt.err (!%p3242_p12)
}
0x1916   :  { %s3246_s30 = scalar_lea.hbm %s3821_s7, 256 }
0x1917   :  { %p3247_p13 = scmp.ne.s32.totalorder %s3821_s7, %s3246_s30  ;;  %p3250_p0 = scmp.lt.u32.totalorder %s3246_s30, %s3821_s7 }
0x1919   :  { %p3252_p1 = pnand %p3250_p0, %p3247_p13 }
0x191b   :  { %3255 = shalt.err (!%p3252_p1)
}
0x191c   :  { %2465 = dma.vmem_to_hbm [thread:$0]  %s2463_s2, 256, %s3821_s7, [#allocation8]  }
0x197f   :  { %v2448_v53 = vpop.permute.xlu0 %2447 }
0x1980   :  { %2450 = vst.msk [vmem:[#allocation4] sm:$0xff] %vm45_vm0, %v2448_v53 }
0x1981   :  { %3258 = dma.done.wait [#allocation8], 256  }
0x1982   :  { %3259 = vsyncadd [#allocation8], 4294967040 }
0x1983   :  { %2469 = vsyncpa [#allocation7], 1 }
0x1984   :  { %2470 = vsyncpa [#allocation8], 1 }

</bundles_post_ra>
